<compile_context>
chip_gen: v5e
topology: v5e:2x2
jax: 0.10.0
libtpu: 0.0.40
codegen_flags: <defaults>
</compile_context>

<pallas_src>
import math

import jax
import jax.numpy as jnp
from jax.experimental import pallas as pl
from jax.experimental.pallas import tpu as pltpu


# ---------------------------------------------------------------------------
# tiling / VMEM helpers
# ---------------------------------------------------------------------------

_VMEM_LIMIT = 48 * 1024 * 1024   # explicit scoped-VMEM limit (< v7x's 64 MiB/TC)
_VMEM_BUDGET = 40 * 1024 * 1024  # planning budget, headroom below the limit


def _round_up(n, m):
    return ((n + m - 1) // m) * m


def _pick_tile(dim, cap):
    """Largest tile <= cap that divides `dim`, trying 128-multiples descending.

    Falls back to the largest divisor of `dim` that is a multiple of 8
    (sublane aligned) or the full dim itself, so the BlockSpec (8, 128) rule
    always holds (full-extent dims are always legal)."""
    for t in (1024, 512, 256, 128):
        if t <= cap and dim % t == 0:
            return t
    for t in range(min(cap, dim), 0, -1):
        if dim % t == 0 and (t % 8 == 0 or t == dim):
            return t
    return dim


def _pick_row_tile(m, bytes_per_row, fixed_bytes):
    """Row tile for the matmul-epilogue kernels, shrunk to fit the VMEM budget."""
    tm = _pick_tile(m, 1024)
    while tm > 128 and tm % 2 == 0 and fixed_bytes + tm * bytes_per_row > _VMEM_BUDGET:
        tm //= 2
    return tm


# ---------------------------------------------------------------------------
# kernel 1: fused 1x1-conv projection  (rows @ W + b), tiled over rows
# ---------------------------------------------------------------------------

def _proj_kernel(x_ref, w_ref, b_ref, o_ref):
    # bf16 operands feed the MXU at full rate; accumulate in f32 (VPU bias add).
    acc = jnp.dot(x_ref[...].astype(jnp.bfloat16), w_ref[...],
                  preferred_element_type=jnp.float32)
    o_ref[...] = (acc + b_ref[...]).astype(o_ref.dtype)


def pointwise_conv(x_flat, w_bf16, bias):
    """x_flat: (M, K), w: (K, N) bf16, bias: (N,) f32 -> (M, N) bf16."""
    M, K = x_flat.shape
    Kw, N = w_bf16.shape
    assert K == Kw
    in_b = x_flat.dtype.itemsize
    bytes_per_row = 2 * (K * in_b + N * 2)          # double-buffered x + bf16 out rows
    fixed_bytes = 2 * (K * N * 2 + N * 4)           # weight + bias buffers
    tm = _pick_row_tile(M, bytes_per_row, fixed_bytes)
    cost = pl.CostEstimate(
        flops=2 * M * K * N,
        transcendentals=0,
        bytes_accessed=M * K * in_b + K * N * 2 + N * 4 + M * N * 2,
    )
    return pl.pallas_call(
        _proj_kernel,
        out_shape=jax.ShapeDtypeStruct((M, N), jnp.bfloat16),
        grid=(M // tm,),
        in_specs=[
            pl.BlockSpec((tm, K), lambda i: (i, 0)),
            pl.BlockSpec((K, N), lambda i: (0, 0)),
            pl.BlockSpec((1, N), lambda i: (0, 0)),
        ],
        out_specs=pl.BlockSpec((tm, N), lambda i: (i, 0)),
        compiler_params=pltpu.CompilerParams(
            dimension_semantics=("parallel",),
            vmem_limit_bytes=_VMEM_LIMIT),
        cost_estimate=cost,
    )(x_flat, w_bf16, bias.reshape(1, N))


# ---------------------------------------------------------------------------
# kernel 2: non-local attention  softmax(theta @ phi^T) @ g
#   - single-pass variant: whole key/value row resident in VMEM
#   - flash-style fallback: online softmax over a kv grid axis
# ---------------------------------------------------------------------------

def _attn_single_kernel(q_ref, k_ref, v_ref, o_ref):
    q = q_ref[...].astype(jnp.bfloat16)                       # (tq, Cqk)
    k = k_ref[...].astype(jnp.bfloat16)                       # (S,  Cqk)
    v = v_ref[...].astype(jnp.bfloat16)                       # (S,  Cv)
    s = jnp.dot(q, k.T, preferred_element_type=jnp.float32)   # (tq, S)
    m = jnp.max(s, axis=-1, keepdims=True)
    p = jnp.exp(s - m)
    l = jnp.sum(p, axis=-1, keepdims=True)
    acc = jnp.dot(p.astype(jnp.bfloat16), v, preferred_element_type=jnp.float32)
    # approx reciprocal runs on the EUP slot (~1e-3 rel error): deliberate,
    # matches the documented tolerance of the reference comparison.
    o_ref[...] = (acc * pl.reciprocal(l, approx=True)).astype(o_ref.dtype)


def _attn_flash_kernel(q_ref, k_ref, v_ref, o_ref, m_sc, l_sc, acc_sc):
    kv = pl.program_id(2)

    @pl.when(kv == 0)
    def _():
        m_sc[...] = jnp.full(m_sc.shape, -jnp.inf, m_sc.dtype)
        l_sc[...] = jnp.zeros(l_sc.shape, l_sc.dtype)
        acc_sc[...] = jnp.zeros(acc_sc.shape, acc_sc.dtype)

    q = q_ref[...].astype(jnp.bfloat16)                       # (tq, Cqk)
    k = k_ref[...].astype(jnp.bfloat16)                       # (tk, Cqk)
    v = v_ref[...].astype(jnp.bfloat16)                       # (tk, Cv)
    s = jnp.dot(q, k.T, preferred_element_type=jnp.float32)   # (tq, tk)
    m_new = jnp.maximum(m_sc[...], jnp.max(s, axis=-1, keepdims=True))
    alpha = jnp.exp(m_sc[...] - m_new)
    p = jnp.exp(s - m_new)
    l_sc[...] = alpha * l_sc[...] + jnp.sum(p, axis=-1, keepdims=True)
    acc_sc[...] = alpha * acc_sc[...] + jnp.dot(
        p.astype(jnp.bfloat16), v, preferred_element_type=jnp.float32)
    m_sc[...] = m_new

    @pl.when(kv == pl.num_programs(2) - 1)
    def _():
        o_ref[...] = (acc_sc[...] *
                      pl.reciprocal(l_sc[...], approx=True)).astype(o_ref.dtype)


def nl_attention(q_arr, k_arr, v_arr, *, qk_w, v_w, q_col, k_col, v_col):
    """softmax(q @ k^T) @ v -> (B, S, v_w) bf16.

    q/k/v are (B, S, *) arrays (possibly the same array); the channel block of
    width qk_w / v_w is selected by the *_col last-axis block index, so fused
    projection outputs need no wrapper-side slicing."""
    B, S, _ = q_arr.shape
    qk_b = q_arr.dtype.itemsize
    v_b = v_arr.dtype.itemsize
    out_shape = jax.ShapeDtypeStruct((B, S, v_w), jnp.bfloat16)
    cost = pl.CostEstimate(
        flops=2 * B * S * S * (qk_w + v_w),
        transcendentals=B * S * S,
        bytes_accessed=B * S * (2 * qk_w * qk_b + v_w * v_b + v_w * 2),
    )

    tq = _pick_tile(S, 512)
    # single-pass VMEM estimate: double-buffered q/k/v/out blocks + f32 score temps
    single_bytes = (2 * (tq * qk_w * qk_b + S * qk_w * qk_b + S * v_w * v_b
                         + tq * v_w * 2) + 2 * tq * S * 4)

    if single_bytes <= _VMEM_BUDGET:
        def q_map(col):
            return lambda b, qi: (b, qi, col)

        def kv_map(col):
            return lambda b, qi: (b, 0, col)

        return pl.pallas_call(
            _attn_single_kernel,
            out_shape=out_shape,
            grid=(B, S // tq),
            in_specs=[
                pl.BlockSpec((pl.Squeezed(), tq, qk_w), q_map(q_col)),
                pl.BlockSpec((pl.Squeezed(), S, qk_w), kv_map(k_col)),
                pl.BlockSpec((pl.Squeezed(), S, v_w), kv_map(v_col)),
            ],
            out_specs=pl.BlockSpec((pl.Squeezed(), tq, v_w),
                                   lambda b, qi: (b, qi, 0)),
            compiler_params=pltpu.CompilerParams(
                dimension_semantics=("parallel", "parallel"),
                vmem_limit_bytes=_VMEM_LIMIT),
            cost_estimate=cost,
        )(q_arr, k_arr, v_arr)

    # guarded fallback: flash-style online softmax when KV does not fit VMEM
    tk = _pick_tile(S, 512)

    def q_map3(col):
        return lambda b, qi, ki: (b, qi, col)

    def kv_map3(col):
        return lambda b, qi, ki: (b, ki, col)

    return pl.pallas_call(
        _attn_flash_kernel,
        out_shape=out_shape,
        grid=(B, S // tq, S // tk),
        in_specs=[
            pl.BlockSpec((pl.Squeezed(), tq, qk_w), q_map3(q_col)),
            pl.BlockSpec((pl.Squeezed(), tk, qk_w), kv_map3(k_col)),
            pl.BlockSpec((pl.Squeezed(), tk, v_w), kv_map3(v_col)),
        ],
        out_specs=pl.BlockSpec((pl.Squeezed(), tq, v_w),
                               lambda b, qi, ki: (b, qi, 0)),
        scratch_shapes=[
            pltpu.VMEM((tq, 1), jnp.float32),    # running max  m
            pltpu.VMEM((tq, 1), jnp.float32),    # running sum  l
            pltpu.VMEM((tq, v_w), jnp.float32),  # accumulator
        ],
        compiler_params=pltpu.CompilerParams(
            dimension_semantics=("parallel", "parallel", "arbitrary"),
            vmem_limit_bytes=_VMEM_LIMIT),
        cost_estimate=cost,
    )(q_arr, k_arr, v_arr)


# ---------------------------------------------------------------------------
# kernel 3: W_z (1x1 conv) + BatchNorm affine + residual, fused epilogue
# ---------------------------------------------------------------------------

def _wz_bn_res_kernel(y_ref, w_ref, b_ref, scale_ref, shift_ref, x_ref, o_ref):
    acc = jnp.dot(y_ref[...].astype(jnp.bfloat16), w_ref[...],
                  preferred_element_type=jnp.float32)
    wy = acc + b_ref[...]
    o_ref[...] = (wy * scale_ref[...] + shift_ref[...] + x_ref[...]).astype(o_ref.dtype)


def wz_bn_residual(y_flat, w_bf16, bias, scale, shift, x_flat):
    """y_flat: (M, K) bf16, w: (K, N) bf16, x_flat: (M, N) residual -> (M, N) f32.

    NOTE: the output last dim is N = in_channels; if it is not a multiple of
    128 the stores are masked.  Padding it would force padding the residual x
    (an extra HBM round trip), so it is left at the natural width."""
    M, K = y_flat.shape
    _, N = w_bf16.shape
    y_b = y_flat.dtype.itemsize
    x_b = x_flat.dtype.itemsize
    bytes_per_row = 2 * (K * y_b + N * x_b + N * 4)   # y + residual + f32 out rows
    fixed_bytes = 2 * (K * N * 2 + 3 * N * 4)
    tm = _pick_row_tile(M, bytes_per_row, fixed_bytes)
    cost = pl.CostEstimate(
        flops=2 * M * K * N + 3 * M * N,
        transcendentals=0,
        bytes_accessed=M * K * y_b + K * N * 2 + 3 * N * 4 + M * N * (x_b + 4),
    )
    return pl.pallas_call(
        _wz_bn_res_kernel,
        out_shape=jax.ShapeDtypeStruct((M, N), jnp.float32),
        grid=(M // tm,),
        in_specs=[
            pl.BlockSpec((tm, K), lambda i: (i, 0)),
            pl.BlockSpec((K, N), lambda i: (0, 0)),
            pl.BlockSpec((1, N), lambda i: (0, 0)),
            pl.BlockSpec((1, N), lambda i: (0, 0)),
            pl.BlockSpec((1, N), lambda i: (0, 0)),
            pl.BlockSpec((tm, N), lambda i: (i, 0)),
        ],
        out_specs=pl.BlockSpec((tm, N), lambda i: (i, 0)),
        compiler_params=pltpu.CompilerParams(
            dimension_semantics=("parallel",),
            vmem_limit_bytes=_VMEM_LIMIT),
        cost_estimate=cost,
    )(y_flat, w_bf16, bias.reshape(1, N), scale.reshape(1, N),
      shift.reshape(1, N), x_flat)


# ---------------------------------------------------------------------------
# module wrapper
# ---------------------------------------------------------------------------

def _conv1x1_init(key, cin, cout):
    kw, kb = jax.random.split(key)
    bound = 1.0 / math.sqrt(cin)
    w = jax.random.uniform(kw, (cin, cout), jnp.float32, -bound, bound)
    b = jax.random.uniform(kb, (cout,), jnp.float32, -bound, bound)
    return w, b


def _pad_cols(w, b, n):
    """Zero-pad the output-channel dim of a (Cin, Cout) weight / (Cout,) bias."""
    return (jnp.pad(w, ((0, 0), (0, n - w.shape[1]))),
            jnp.pad(b, (0, n - b.shape[0])))


class NLBlockNDPallas:
    """2-D Non-Local Block (NLBlockND) forward pass built from Pallas kernels."""

    def __init__(self, in_channels, inter_channels=None, mode='embedded',
                 bn_layer=True, *, key):
        if mode not in ('gaussian', 'embedded', 'dot'):
            raise ValueError('`mode` must be one of `gaussian`, `embedded`, `dot`')
        if mode == 'dot':
            # TODO(synk): `dot` mode (f / N normalization instead of softmax)
            # needs a non-softmax attention variant; not ported.
            raise NotImplementedError('`dot` mode is not implemented in the Pallas port')
        self.mode = mode
        self.in_channels = in_channels
        self.inter_channels = inter_channels
        if self.inter_channels is None:
            self.inter_channels = max(in_channels // 2, 1)
        C, Ci = self.in_channels, self.inter_channels
        self.ci_pad = _round_up(Ci, 128)   # lane-dense attention channel width

        k_g, k_t, k_p, k_w = jax.random.split(key, 4)
        self.g_w, self.g_b = _conv1x1_init(k_g, C, Ci)
        if mode == 'embedded':
            self.theta_w, self.theta_b = _conv1x1_init(k_t, C, Ci)
            self.phi_w, self.phi_b = _conv1x1_init(k_p, C, Ci)
        self.wz_w, self.wz_b = _conv1x1_init(k_w, Ci, C)

        self.bn_layer = bn_layer
        if bn_layer:
            # Matches nn.init.constant_(W_z[1].weight/bias, 0): identity at init.
            # TODO(synk): BatchNorm uses inference-mode running statistics only;
            # training-mode batch statistics are not computed in-kernel.
            self.bn_gamma = jnp.zeros((C,), jnp.float32)
            self.bn_beta = jnp.zeros((C,), jnp.float32)
            self.bn_mean = jnp.zeros((C,), jnp.float32)
            self.bn_var = jnp.ones((C,), jnp.float32)
            self.bn_eps = 1e-5
        else:
            # Reference module zeroes the plain-conv W_z in this branch.
            self.wz_w = jnp.zeros_like(self.wz_w)
            self.wz_b = jnp.zeros_like(self.wz_b)

        # ---- precomputed kernel parameters, zero-padded to 128-lane widths ----
        Cp = self.ci_pad
        g_wp, g_bp = _pad_cols(self.g_w, self.g_b, Cp)
        if mode == 'embedded':
            t_wp, t_bp = _pad_cols(self.theta_w, self.theta_b, Cp)
            p_wp, p_bp = _pad_cols(self.phi_w, self.phi_b, Cp)
            # fused theta|phi|g projection -> column blocks 0|1|2, each width Cp
            self._w_qkv = jnp.concatenate([t_wp, p_wp, g_wp], axis=1).astype(jnp.bfloat16)
            self._b_qkv = jnp.concatenate([t_bp, p_bp, g_bp], axis=0)
        else:
            self._w_g = g_wp.astype(jnp.bfloat16)
            self._b_g = g_bp
        # W_z consumes the Cp-padded y; padded weight rows are zero -> exact.
        self._w_z = jnp.pad(self.wz_w, ((0, Cp - Ci), (0, 0))).astype(jnp.bfloat16)

    def _bn_affine(self):
        C = self.in_channels
        if self.bn_layer:
            scale = self.bn_gamma / jnp.sqrt(self.bn_var + self.bn_eps)
            shift = self.bn_beta - self.bn_mean * scale
        else:
            scale = jnp.ones((C,), jnp.float32)
            shift = jnp.zeros((C,), jnp.float32)
        return scale, shift

    def __call__(self, x):
        """x: (B, C, H, W) float32 -> z: (B, C, H, W) float32."""
        B, C, H, W = x.shape
        assert C == self.in_channels
        Cp = self.ci_pad
        S = H * W

        # TODO(synk): the NCHW<->NHWC transposes are layout plumbing kept only
        # to honour the module's NCHW contract; drop them if the surrounding
        # model can produce/consume channels-last tensors directly.
        x_cl = jnp.transpose(x, (0, 2, 3, 1)).reshape(B, S, C)
        x_flat = x_cl.reshape(B * S, C)

        if self.mode == 'embedded':
            proj = pointwise_conv(x_flat, self._w_qkv, self._b_qkv)  # (B*S, 3*Cp) bf16
            proj = proj.reshape(B, S, 3 * Cp)
            # theta/phi/g are column blocks 0/1/2 of `proj`, selected by the
            # attention BlockSpec index_maps (no wrapper-side slicing).
            y = nl_attention(proj, proj, proj, qk_w=Cp, v_w=Cp,
                             q_col=0, k_col=1, v_col=2)              # (B, S, Cp) bf16
        else:  # 'gaussian': theta = phi = x
            g_x = pointwise_conv(x_flat, self._w_g, self._b_g).reshape(B, S, Cp)
            y = nl_attention(x_cl, x_cl, g_x, qk_w=C, v_w=Cp,
                             q_col=0, k_col=0, v_col=0)

        # W_z (1x1 conv) + BatchNorm affine + residual, fused in one kernel.
        scale, shift = self._bn_affine()
        z_flat = wz_bn_residual(y.reshape(B * S, Cp), self._w_z, self.wz_b,
                                scale, shift, x_flat)                # (B*S, C) f32

        z = z_flat.reshape(B, H, W, C)
        return jnp.transpose(z, (0, 3, 1, 2))


# ---------------------------------------------------------------------------
# pure-JAX reference (mirrors the kernels' bf16-operand / f32-accumulate math)
# ---------------------------------------------------------------------------

def nlblock_reference(mod, x):
    bf16 = jnp.bfloat16
    B, C, H, W = x.shape
    S = H * W
    x_cl = jnp.transpose(x, (0, 2, 3, 1)).reshape(B, S, C)

    def conv1x1(inp, w, b):
        return jnp.dot(inp.astype(bf16), w.astype(bf16),
                       preferred_element_type=jnp.float32) + b

    g_x = conv1x1(x_cl, mod.g_w, mod.g_b)
    if mod.mode == 'embedded':
        theta_x = conv1x1(x_cl, mod.theta_w, mod.theta_b)
        phi_x = conv1x1(x_cl, mod.phi_w, mod.phi_b)
    else:
        theta_x = x_cl
        phi_x = x_cl

    f = jnp.einsum('bqc,bkc->bqk', theta_x.astype(bf16), phi_x.astype(bf16),
                   preferred_element_type=jnp.float32)
    p = jax.nn.softmax(f, axis=-1)
    y = jnp.einsum('bqk,bkc->bqc', p.astype(bf16), g_x.astype(bf16),
                   preferred_element_type=jnp.float32)

    wy = conv1x1(y, mod.wz_w, mod.wz_b)
    scale, shift = mod._bn_affine()
    z_cl = wy * scale + shift + x_cl
    return jnp.transpose(z_cl.reshape(B, H, W, C), (0, 3, 1, 2))


if __name__ == "__main__":
    key = jax.random.PRNGKey(0)
    k_param, k_x, k_gamma, k_beta = jax.random.split(key, 4)

    batch, channels, height, width = 2, 64, 16, 16
    mod = NLBlockNDPallas(in_channels=channels, mode='embedded',
                          bn_layer=True, key=k_param)

    # The PyTorch init zeroes BN gamma/beta, which makes the whole block an
    # identity (z == x) and would hide bugs; override with random values so the
    # test exercises the full data path. Forward semantics are unchanged.
    mod.bn_gamma = jax.random.normal(k_gamma, (channels,), jnp.float32)
    mod.bn_beta = jax.random.normal(k_beta, (channels,), jnp.float32)

    x = jax.random.normal(k_x, (batch, channels, height, width), jnp.float32)

    z = jax.block_until_ready(mod(x))
    z_ref = nlblock_reference(mod, x)
    assert z.shape == x.shape
    max_err = float(jnp.max(jnp.abs(z - z_ref)))
    assert jnp.allclose(z, z_ref, atol=5e-2, rtol=5e-2), max_err

    # Also exercise the `gaussian` path (theta = phi = x, unprojected queries).
    mod_g = NLBlockNDPallas(in_channels=channels, mode='gaussian',
                            bn_layer=True, key=k_param)
    mod_g.bn_gamma = mod.bn_gamma
    mod_g.bn_beta = mod.bn_beta
    z_g = jax.block_until_ready(mod_g(x))
    z_g_ref = nlblock_reference(mod_g, x)
    max_err_g = float(jnp.max(jnp.abs(z_g - z_g_ref)))
    assert jnp.allclose(z_g, z_g_ref, atol=5e-2, rtol=5e-2), max_err_g

    print("KERNEL_OK")
</pallas_src>

<mosaic_0001>
module attributes {stable_mosaic.version = 11 : i64} {
  func.func @_proj_kernel(%arg0: i32, %arg1: memref<512x64xf32, #tpu.memory_space<vmem>>, %arg2: memref<64x384xbf16, #tpu.memory_space<vmem>>, %arg3: memref<1x384xf32, #tpu.memory_space<vmem>>, %arg4: memref<512x384xbf16, #tpu.memory_space<vmem>>) attributes {dimension_semantics = [#tpu.dimension_semantics<parallel>], iteration_bounds = array<i64: 1>, scalar_prefetch = 0 : i64, scratch_operands = 0 : i64, tpu.core_type = #tpu.core_type<tc>, window_params = [{transform_indices = @transform_0, window_bounds = array<i64: 512, 64>}, {pipeline_mode = #tpu.pipeline_mode<synchronous>, transform_indices = @transform_1, window_bounds = array<i64: 64, 384>}, {pipeline_mode = #tpu.pipeline_mode<synchronous>, transform_indices = @transform_2, window_bounds = array<i64: 1, 384>}, {transform_indices = @transform_3, window_bounds = array<i64: 512, 384>}]} {
    %c0 = arith.constant 0 : index
    %c0_0 = arith.constant 0 : index
    %0 = vector.load %arg1[%c0, %c0_0] : memref<512x64xf32, #tpu.memory_space<vmem>>, vector<512x64xf32>
    %1 = arith.truncf %0 : vector<512x64xf32> to vector<512x64xbf16>
    %c0_1 = arith.constant 0 : index
    %c0_2 = arith.constant 0 : index
    %2 = vector.load %arg2[%c0_1, %c0_2] : memref<64x384xbf16, #tpu.memory_space<vmem>>, vector<64x384xbf16>
    %cst = arith.constant dense<0.000000e+00> : vector<512x384xf32>
    %3 = tpu.matmul %1, %2, %cst {dimension_numbers = #tpu.dot_dimension_numbers<[1], [0], [0], [1], [0, 0, 1, 1], [], []>} : vector<512x64xbf16>, vector<64x384xbf16>, vector<512x384xf32> -> vector<512x384xf32>
    %c0_3 = arith.constant 0 : index
    %c0_4 = arith.constant 0 : index
    %4 = vector.load %arg3[%c0_3, %c0_4] : memref<1x384xf32, #tpu.memory_space<vmem>>, vector<1x384xf32>
    %5 = vector.broadcast %4 : vector<1x384xf32> to vector<512x384xf32>
    %6 = arith.addf %3, %5 : vector<512x384xf32>
    %7 = arith.truncf %6 : vector<512x384xf32> to vector<512x384xbf16>
    %c0_5 = arith.constant 0 : index
    %c0_6 = arith.constant 0 : index
    %8 = vector.load %arg4[%c0_5, %c0_6] : memref<512x384xbf16, #tpu.memory_space<vmem>>, vector<512x384xbf16>
    tpu.vector_store %arg4[%c0_5, %c0_6], %7 {strides = array<i32>} : memref<512x384xbf16, #tpu.memory_space<vmem>>, vector<512x384xbf16>,
    return
  }
  func.func @transform_0(%arg0: i32) -> (i32, i32) {
    %c0_i32 = arith.constant 0 : i32
    %c0_i32_0 = arith.constant 0 : i32
    return %arg0, %c0_i32 : i32, i32
  }
  func.func @transform_1(%arg0: i32) -> (i32, i32) {
    %c0_i32 = arith.constant 0 : i32
    %c0_i32_0 = arith.constant 0 : i32
    %c0_i32_1 = arith.constant 0 : i32
    return %c0_i32, %c0_i32_0 : i32, i32
  }
  func.func @transform_2(%arg0: i32) -> (i32, i32) {
    %c0_i32 = arith.constant 0 : i32
    %c0_i32_0 = arith.constant 0 : i32
    %c0_i32_1 = arith.constant 0 : i32
    return %c0_i32, %c0_i32_0 : i32, i32
  }
  func.func @transform_3(%arg0: i32) -> (i32, i32) {
    %c0_i32 = arith.constant 0 : i32
    %c0_i32_0 = arith.constant 0 : i32
    return %arg0, %c0_i32 : i32, i32
  }
}

</mosaic_0001>

<bundles_post_ra>
// kernel: tpu_custom_call.1
= control target key start
LH: loop header
LB: loop body
LE: loop exit
PB: predicated region body
PF: predicated region fallthrough
CT: control target
= control target key end

     0   :  { %s1954_s0 = inlined_call_operand.vmem [shape: f32[512,64], index: 0, kind: input, shape index: {}]   ;;  %s1955_s1 = inlined_call_operand.vmem [shape: bf16[64,384], index: 1, kind: input, shape index: {}]   ;;  %s1956_s2 = inlined_call_operand.vmem [shape: f32[1,384], index: 2, kind: input, shape index: {}]   ;;  %s1957_s3 = inlined_call_operand.hbm [shape: bf16[512,384], index: 3, kind: output, shape index: {}]  }
   0x1   :  { %v1116_v0 = vld [vmem:[%s1955_s1 + $0x48] sm:$0xf]  ;;  %v1232_v1 = vld [vmem:[%s1955_s1 + $0x50] sm:$0xf0]  ;;  %v1231_v2 = vld [vmem:[%s1955_s1 + $0x4c] sm:$0xf] }
   0x2   :  { %v1117_v3 = vor.u32 %v1232_v1, %v1116_v0  ;;  %v1118_v4 = vld [vmem:[%s1955_s1 + $0x54] sm:$0xf0]  ;;  %v1124_v5 = vld [vmem:[%s1955_s1 + $0x50] sm:$0xf]  ;;  %v1233_v6 = vld [vmem:[%s1955_s1 + $0x58] sm:$0xf0] }
   0x3   :  { %v1121_v7 = vor.u32 %v1231_v2, %v1118_v4  ;;  %v1316_v8 = vor.u32 %v1233_v6, %v1124_v5  ;;  %v1104_v9 = vld [vmem:[%s1955_s1 + $0x30] sm:$0xf]  ;;  %v1229_v10 = vld [vmem:[%s1955_s1 + $0x38] sm:$0xf0]  ;;  %v1228_v11 = vld [vmem:[%s1955_s1 + $0x34] sm:$0xf] }
   0x4   :  { %301 = vmatpush.bf16.msra.mxu0 %v1117_v3  ;;  %1234 = vmatpush.bf16.msra.mxu3 %v1117_v3  ;;  %v1105_v12 = vor.u32 %v1229_v10, %v1104_v9  ;;  %v1106_v13 = vld [vmem:[%s1955_s1 + $0x3c] sm:$0xf0]  ;;  %v1112_v14 = vld [vmem:[%s1955_s1 + $0x38] sm:$0xf]  ;;  %v1230_v15 = vld [vmem:[%s1955_s1 + $0x40] sm:$0xf0] }
   0x5   :  { %470 = vmatpush.bf16.msra.mxu1 %v1121_v7  ;;  %639 = vmatpush.bf16.msra.mxu2 %v1316_v8  ;;  %v1109_v16 = vor.u32 %v1228_v11, %v1106_v13  ;;  %v1113_v17 = vor.u32 %v1230_v15, %v1112_v14  ;;  %v1092_v18 = vld [vmem:[%s1955_s1 + $0x18] sm:$0xf]  ;;  %v1226_v19 = vld [vmem:[%s1955_s1 + $0x20] sm:$0xf0]  ;;  %v1225_v20 = vld [vmem:[%s1955_s1 + $0x1c] sm:$0xf] }
   0x6   :  { %v1094_v21 = vld [vmem:[%s1955_s1 + $0x24] sm:$0xf0]  ;;  %v1100_v22 = vld [vmem:[%s1955_s1 + $0x20] sm:$0xf]  ;;  %v1227_v23 = vld [vmem:[%s1955_s1 + $0x28] sm:$0xf0]  ;;  %v1093_v24 = vor.u32 %v1226_v19, %v1092_v18 }
   0x7   :  { %v1097_v25 = vor.u32 %v1225_v20, %v1094_v21  ;;  %v1101_v26 = vor.u32 %v1227_v23, %v1100_v22  ;;  %v1080_v27 = vld [vmem:[%s1955_s1] sm:$0xf]  ;;  %v1223_v28 = vld [vmem:[%s1955_s1 + $0x8] sm:$0xf0]  ;;  %v1222_v29 = vld [vmem:[%s1955_s1 + $0x4] sm:$0xf] }
   0x8   :  { %302 = vmatpush.bf16.msra.mxu0 %v1105_v12  ;;  %1235 = vmatpush.bf16.msra.mxu3 %v1105_v12  ;;  %v1082_v30 = vld [vmem:[%s1955_s1 + $0xc] sm:$0xf0]  ;;  %v1088_v31 = vld [vmem:[%s1955_s1 + $0x8] sm:$0xf]  ;;  %v1224_v32 = vld [vmem:[%s1955_s1 + $0x10] sm:$0xf0]  ;;  %v1081_v35 = vor.u32 %v1223_v28, %v1080_v27 }
   0x9   :  { %471 = vmatpush.bf16.msra.mxu1 %v1109_v16  ;;  %640 = vmatpush.bf16.msra.mxu2 %v1113_v17  ;;  %v16_v33 = vld [vmem:[%s1954_s0] sm:$0xff]  ;;  %v17_v34 = vld [vmem:[%s1954_s0 + $0x8] sm:$0xff] }
   0xa   :  { %v64_v36 = vld [vmem:[%s1954_s0 + $0x180] sm:$0xff]  ;;  %v65_v37 = vld [vmem:[%s1954_s0 + $0x188] sm:$0xff] }
   0xc   :  { %303 = vmatpush.bf16.msra.mxu0 %v1093_v24  ;;  %1236 = vmatpush.bf16.msra.mxu3 %v1093_v24 }
   0xd   :  { %8 = vsyncpa [#allocation3], 0  ;;  %472 = vmatpush.bf16.msra.mxu1 %v1097_v25  ;;  %641 = vmatpush.bf16.msra.mxu2 %v1101_v26  ;;  %v1085_v38 = vor.u32 %v1222_v29, %v1082_v30  ;;  %v1089_v39 = vor.u32 %v1224_v32, %v1088_v31  ;;  %v80_v40 = vpack.c.bf16 %v17_v34, %v16_v33  ;;  %vm200_vm0 = vcmask 523264   ;;  %v18_v42 = vld [vmem:[%s1954_s0 + $0x10] sm:$0xff]  ;;  %v19_v43 = vld [vmem:[%s1954_s0 + $0x18] sm:$0xff]  ;;  %s1066_s23 = sshll.u32 %s1957_s3, 4  ;;  %s1067_s23 = int_to_ptr.hbm [resolvable:$true] %s1066_s23 }
   0xe   :  { %v1385_v41 = vpack.c.bf16 %v65_v37, %v64_v36  ;;  %v66_v44 = vld [vmem:[%s1954_s0 + $0x190] sm:$0xff]  ;;  %v67_v45 = vld [vmem:[%s1954_s0 + $0x198] sm:$0xff]  ;;  %v81_v46 = vpack.c.bf16 %v19_v43, %v18_v42  ;;  %v20_v48 = vld [vmem:[%s1954_s0 + $0x20] sm:$0xff]  ;;  %s1276_s24 = smov 192   ;;  %s1277_s25 = smov 12  }
   0xf   :  { %v1404_v47 = vpack.c.bf16 %v67_v45, %v66_v44  ;;  %v21_v49 = vld [vmem:[%s1954_s0 + $0x28] sm:$0xff]  ;;  %v68_v50 = vld [vmem:[%s1954_s0 + $0x1a0] sm:$0xff]  ;;  %v22_v54 = vld [vmem:[%s1954_s0 + $0x30] sm:$0xff] }
  0x10   :  { %304 = vmatpush.bf16.msra.mxu0 %v1081_v35  ;;  %1237 = vmatpush.bf16.msra.mxu3 %v1081_v35  ;;  %v69_v51 = vld [vmem:[%s1954_s0 + $0x1a8] sm:$0xff]  ;;  %v82_v52 = vpack.c.bf16 %v21_v49, %v20_v48  ;;  %v23_v55 = vld [vmem:[%s1954_s0 + $0x38] sm:$0xff]  ;;  %v70_v56 = vld [vmem:[%s1954_s0 + $0x1b0] sm:$0xff] }
  0x11   :  { %473 = vmatpush.bf16.msra.mxu1 %v1085_v38  ;;  %642 = vmatpush.bf16.msra.mxu2 %v1089_v39  ;;  %v1424_v53 = vpack.c.bf16 %v69_v51, %v68_v50  ;;  %v71_v57 = vld [vmem:[%s1954_s0 + $0x1b8] sm:$0xff]  ;;  %v83_v58 = vpack.c.bf16 %v23_v55, %v22_v54  ;;  %v24_v60 = vld [vmem:[%s1954_s0 + $0x40] sm:$0xff]  ;;  %v25_v61 = vld [vmem:[%s1954_s0 + $0x48] sm:$0xff] }
  0x12   :  { %v1443_v59 = vpack.c.bf16 %v71_v57, %v70_v56  ;;  %v72_v62 = vld [vmem:[%s1954_s0 + $0x1c0] sm:$0xff]  ;;  %v73_v63 = vld [vmem:[%s1954_s0 + $0x1c8] sm:$0xff]  ;;  %v84_v0 = vpack.c.bf16 %v25_v61, %v24_v60  ;;  %v26_v2 = vld [vmem:[%s1954_s0 + $0x50] sm:$0xff] }
  0x13   :  { %1126 = vmatmul.msk.bf16.vlgmr.msra.gmra.mxu0 %vm200_vm0, %v80_v40  ;;  %1150 = vmatmul.msk.bf16.vlgmr.msra.gmra.mxu3 %vm200_vm0, %v1385_v41  ;;  %v1462_v1 = vpack.c.bf16 %v73_v63, %v72_v62  ;;  %v27_v3 = vld [vmem:[%s1954_s0 + $0x58] sm:$0xff]  ;;  %v74_v4 = vld [vmem:[%s1954_s0 + $0x1d0] sm:$0xff]  ;;  %v29_v9 = vld [vmem:[%s1954_s0 + $0x68] sm:$0xff] }
  0x14   :  { %1238 = vmatpush.bf16.msrb.mxu3 %v1121_v7  ;;  %1158 = vmatmul.msk.bf16.vlgmr.msra.gmra.mxu1 %vm200_vm0, %v80_v40  ;;  %v75_v5 = vld [vmem:[%s1954_s0 + $0x1d8] sm:$0xff]  ;;  %v85_v6 = vpack.c.bf16 %v27_v3, %v26_v2  ;;  %v76_v10 = vld [vmem:[%s1954_s0 + $0x1e0] sm:$0xff]  ;;  %v77_v11 = vld [vmem:[%s1954_s0 + $0x1e8] sm:$0xff] }
  0x15   :  { %1190 = vmatmul.msk.bf16.vlgmr.msra.gmra.mxu2 %vm200_vm0, %v80_v40  ;;  %v1481_v7 = vpack.c.bf16 %v75_v5, %v74_v4  ;;  %v1500_v13 = vpack.c.bf16 %v77_v11, %v76_v10  ;;  %v30_v14 = vld [vmem:[%s1954_s0 + $0x70] sm:$0xff]  ;;  %v31_v15 = vld [vmem:[%s1954_s0 + $0x78] sm:$0xff]  ;;  %v128_v20 = vld [vmem:[%s1956_s2] sm:$0x7] }
  0x16   :  { %v87_v18 = vpack.c.bf16 %v31_v15, %v30_v14  ;;  %v32_v21 = vld [vmem:[%s1954_s0 + $0x80] sm:$0xff]  ;;  %v33_v22 = vld [vmem:[%s1954_s0 + $0x88] sm:$0xff]  ;;  %v1535_v23 = vperm.slane %v128_v20, 0  ;;  %v1537_v24 = vperm.slane %v128_v20, 1  ;;  %v1546_v31 = vperm.slane %v128_v20, 2  ;;  %v34_v42 = vld [vmem:[%s1954_s0 + $0x90] sm:$0xff] }
  0x17   :  { %v35_v43 = vld [vmem:[%s1954_s0 + $0x98] sm:$0xff]  ;;  %v36_v3 = vld [vmem:[%s1954_s0 + $0xa0] sm:$0xff]  ;;  %v37_v4 = vld [vmem:[%s1954_s0 + $0xa8] sm:$0xff] }
  0x18   :  { %1239 = vmatpush.bf16.msrb.mxu3 %v1109_v16  ;;  %v78_v16 = vld [vmem:[%s1954_s0 + $0x1f0] sm:$0xff] }
  0x1c   :  { %1240 = vmatpush.bf16.msrb.mxu3 %v1097_v25  ;;  %v88_v25 = vpack.c.bf16 %v33_v22, %v32_v21 }
  0x20   :  { %1241 = vmatpush.bf16.msrb.mxu3 %v1085_v38 }
  0x23   :  { %1127 = vmatmul.msk.bf16.gmra.mxu0 %vm200_vm0, %v81_v46  ;;  %1151 = vmatmul.msk.bf16.gmra.mxu3 %vm200_vm0, %v1404_v47 }
  0x24   :  { %1242 = vmatpush.bf16.msra.mxu3 %v1316_v8  ;;  %1159 = vmatmul.msk.bf16.gmra.mxu1 %vm200_vm0, %v81_v46  ;;  %v28_v8 = vld [vmem:[%s1954_s0 + $0x60] sm:$0xff] }
  0x25   :  { %1191 = vmatmul.msk.bf16.gmra.mxu2 %vm200_vm0, %v81_v46  ;;  %v86_v12 = vpack.c.bf16 %v29_v9, %v28_v8  ;;  %v89_v46 = vpack.c.bf16 %v35_v43, %v34_v42  ;;  %v90_v8 = vpack.c.bf16 %v37_v4, %v36_v3 }
  0x28   :  { %1243 = vmatpush.bf16.msra.mxu3 %v1113_v17  ;;  %v79_v17 = vld [vmem:[%s1954_s0 + $0x1f8] sm:$0xff] }
  0x29   :  { %v1519_v19 = vpack.c.bf16 %v79_v17, %v78_v16 }
  0x2c   :  { %1244 = vmatpush.bf16.msra.mxu3 %v1101_v26 }
  0x30   :  { %1245 = vmatpush.bf16.msra.mxu3 %v1089_v39 }
  0x33   :  { %1128 = vmatmul.msk.bf16.gmra.mxu0 %vm200_vm0, %v82_v52  ;;  %1152 = vmatmul.msk.bf16.gmra.mxu3 %vm200_vm0, %v1424_v53 }
  0x34   :  { %1160 = vmatmul.msk.bf16.gmra.mxu1 %vm200_vm0, %v82_v52 }
  0x35   :  { %1192 = vmatmul.msk.bf16.gmra.mxu2 %vm200_vm0, %v82_v52 }
  0x43   :  { %1129 = vmatmul.msk.bf16.gmra.mxu0 %vm200_vm0, %v83_v58  ;;  %1153 = vmatmul.msk.bf16.gmra.mxu3 %vm200_vm0, %v1443_v59 }
  0x44   :  { %1161 = vmatmul.msk.bf16.gmra.mxu1 %vm200_vm0, %v83_v58 }
  0x45   :  { %1193 = vmatmul.msk.bf16.gmra.mxu2 %vm200_vm0, %v83_v58 }
  0x53   :  { %1130 = vmatmul.msk.bf16.gmra.mxu0 %vm200_vm0, %v84_v0  ;;  %1154 = vmatmul.msk.bf16.gmra.mxu3 %vm200_vm0, %v1462_v1 }
  0x54   :  { %1162 = vmatmul.msk.bf16.gmra.mxu1 %vm200_vm0, %v84_v0 }
  0x55   :  { %1194 = vmatmul.msk.bf16.gmra.mxu2 %vm200_vm0, %v84_v0 }
  0x63   :  { %1131 = vmatmul.msk.bf16.gmra.mxu0 %vm200_vm0, %v85_v6  ;;  %1155 = vmatmul.msk.bf16.gmra.mxu3 %vm200_vm0, %v1481_v7 }
  0x64   :  { %1163 = vmatmul.msk.bf16.gmra.mxu1 %vm200_vm0, %v85_v6 }
  0x65   :  { %1195 = vmatmul.msk.bf16.gmra.mxu2 %vm200_vm0, %v85_v6 }
  0x73   :  { %1132 = vmatmul.msk.bf16.gmra.mxu0 %vm200_vm0, %v86_v12  ;;  %1156 = vmatmul.msk.bf16.gmra.mxu3 %vm200_vm0, %v1500_v13 }
  0x74   :  { %1164 = vmatmul.msk.bf16.gmra.mxu1 %vm200_vm0, %v86_v12 }
  0x75   :  { %1196 = vmatmul.msk.bf16.gmra.mxu2 %vm200_vm0, %v86_v12 }
  0x83   :  { %1133 = vmatmul.msk.bf16.gmra.mxu0 %vm200_vm0, %v87_v18  ;;  %1157 = vmatmul.msk.bf16.gmra.mxu3 %vm200_vm0, %v1519_v19 }
  0x84   :  { %1165 = vmatmul.msk.bf16.gmra.mxu1 %vm200_vm0, %v87_v18 }
  0x85   :  { %1197 = vmatmul.msk.bf16.gmra.mxu2 %vm200_vm0, %v87_v18 }
  0x90   :  { %v306_v26 = vpop.f32.mrf.mxu0 }
  0x91   :  { %v307_v27 = vadd.f32 %v306_v26, %v1535_v23  ;;  %v475_v28 = vpop.f32.mrf.mxu1 }
  0x92   :  { %v476_v29 = vadd.f32 %v475_v28, %v1537_v24 }
  0x93   :  { %1134 = vmatmul.msk.bf16.gmra.mxu0 %vm200_vm0, %v88_v25  ;;  %1182 = vmatmul.msk.bf16.vlgmr.msrb.gmra.mxu3 %vm200_vm0, %v1385_v41 }
  0x94   :  { %v804_v30 = vpack.c.bf16 %v476_v29, %v307_v27  ;;  %1166 = vmatmul.msk.bf16.gmra.mxu1 %vm200_vm0, %v88_v25  ;;  %v38_v29 = vld [vmem:[%s1954_s0 + $0xb0] sm:$0xff] }
  0x95   :  { %1198 = vmatmul.msk.bf16.gmra.mxu2 %vm200_vm0, %v88_v25 }
  0x96   :  { %932 = vst [vmem:[#allocation2] sm:$0xff] %v804_v30  ;;  %v1548_v32 = vpop.f32.mrf.mxu3  ;;  %v39_v30 = vld [vmem:[%s1954_s0 + $0xb8] sm:$0xff] }
  0x98   :  { %v644_v33 = vpop.f32.mrf.mxu2  ;;  %v308_v35 = vpop.f32.mrf.mxu0 }
  0x99   :  { %v645_v34 = vadd.f32 %v644_v33, %v1546_v31  ;;  %v309_v36 = vadd.f32 %v308_v35, %v1535_v23  ;;  %v477_v37 = vpop.f32.mrf.mxu1  ;;  %v91_v35 = vpack.c.bf16 %v39_v30, %v38_v29 }
  0x9a   :  { %v478_v39 = vadd.f32 %v477_v37, %v1537_v24 }
  0x9b   :  { %v805_v38 = vpack.c.bf16 %v645_v34, %v645_v34 }
  0x9c   :  { %v806_v40 = vpack.c.bf16 %v478_v39, %v309_v36 }
  0x9d   :  { %933 = vst [vmem:[#allocation2 + $0x8] sm:$0xf] %v805_v38 }
  0x9e   :  { %934 = vst [vmem:[#allocation2 + $0xc] sm:$0xff] %v806_v40  ;;  %v1559_v44 = vpop.f32.mrf.mxu3 }
  0xa0   :  { %v646_v45 = vpop.f32.mrf.mxu2  ;;  %v311_v49 = vpop.f32.mrf.mxu0 }
  0xa1   :  { %v647_v48 = vadd.f32 %v646_v45, %v1546_v31  ;;  %v312_v50 = vadd.f32 %v311_v49, %v1535_v23  ;;  %v480_v51 = vpop.f32.mrf.mxu1 }
  0xa2   :  { %v481_v54 = vadd.f32 %v480_v51, %v1537_v24 }
  0xa3   :  { %v807_v52 = vpack.c.bf16 %v647_v48, %v647_v48  ;;  %1135 = vmatmul.msk.bf16.gmra.mxu0 %vm200_vm0, %v89_v46  ;;  %1183 = vmatmul.msk.bf16.gmra.mxu3 %vm200_vm0, %v1404_v47 }
  0xa4   :  { %v808_v55 = vpack.c.bf16 %v481_v54, %v312_v50  ;;  %1167 = vmatmul.msk.bf16.gmra.mxu1 %vm200_vm0, %v89_v46 }
  0xa5   :  { %935 = vst [vmem:[#allocation2 + $0x14] sm:$0xf] %v807_v52  ;;  %1199 = vmatmul.msk.bf16.gmra.mxu2 %vm200_vm0, %v89_v46 }
  0xa6   :  { %936 = vst [vmem:[#allocation2 + $0x18] sm:$0xff] %v808_v55  ;;  %v1569_v56 = vpop.f32.mrf.mxu3 }
  0xa8   :  { %v649_v57 = vpop.f32.mrf.mxu2  ;;  %v313_v60 = vpop.f32.mrf.mxu0 }
  0xa9   :  { %v650_v58 = vadd.f32 %v649_v57, %v1546_v31  ;;  %v314_v61 = vadd.f32 %v313_v60, %v1535_v23  ;;  %v482_v62 = vpop.f32.mrf.mxu1  ;;  %v40_v57 = vld [vmem:[%s1954_s0 + $0xc0] sm:$0xff] }
  0xaa   :  { %v483_v0 = vadd.f32 %v482_v62, %v1537_v24 }
  0xab   :  { %v809_v63 = vpack.c.bf16 %v650_v58, %v650_v58  ;;  %v41_v58 = vld [vmem:[%s1954_s0 + $0xc8] sm:$0xff] }
  0xac   :  { %v810_v2 = vpack.c.bf16 %v483_v0, %v314_v61  ;;  %v92_v62 = vpack.c.bf16 %v41_v58, %v40_v57 }
  0xad   :  { %937 = vst [vmem:[#allocation2 + $0x20] sm:$0xf] %v809_v63 }
  0xae   :  { %938 = vst [vmem:[#allocation2 + $0x24] sm:$0xff] %v810_v2  ;;  %v1580_v5 = vpop.f32.mrf.mxu3 }
  0xb0   :  { %v651_v6 = vpop.f32.mrf.mxu2  ;;  %v316_v10 = vpop.f32.mrf.mxu0 }
  0xb1   :  { %v652_v9 = vadd.f32 %v651_v6, %v1546_v31  ;;  %v317_v11 = vadd.f32 %v316_v10, %v1535_v23  ;;  %v485_v12 = vpop.f32.mrf.mxu1 }
  0xb2   :  { %v486_v15 = vadd.f32 %v485_v12, %v1537_v24 }
  0xb3   :  { %v811_v14 = vpack.c.bf16 %v652_v9, %v652_v9  ;;  %1136 = vmatmul.msk.bf16.gmra.mxu0 %vm200_vm0, %v90_v8  ;;  %1184 = vmatmul.msk.bf16.gmra.mxu3 %vm200_vm0, %v1424_v53 }
  0xb4   :  { %v812_v16 = vpack.c.bf16 %v486_v15, %v317_v11  ;;  %1168 = vmatmul.msk.bf16.gmra.mxu1 %vm200_vm0, %v90_v8 }
  0xb5   :  { %939 = vst [vmem:[#allocation2 + $0x2c] sm:$0xf] %v811_v14  ;;  %1200 = vmatmul.msk.bf16.gmra.mxu2 %vm200_vm0, %v90_v8 }
  0xb6   :  { %940 = vst [vmem:[#allocation2 + $0x30] sm:$0xff] %v812_v16  ;;  %v1590_v17 = vpop.f32.mrf.mxu3 }
  0xb8   :  { %v654_v18 = vpop.f32.mrf.mxu2  ;;  %v318_v21 = vpop.f32.mrf.mxu0 }
  0xb9   :  { %v655_v20 = vadd.f32 %v654_v18, %v1546_v31  ;;  %v319_v22 = vadd.f32 %v318_v21, %v1535_v23  ;;  %v487_v25 = vpop.f32.mrf.mxu1  ;;  %v42_v21 = vld [vmem:[%s1954_s0 + $0xd0] sm:$0xff] }
  0xba   :  { %v488_v27 = vadd.f32 %v487_v25, %v1537_v24 }
  0xbb   :  { %v813_v26 = vpack.c.bf16 %v655_v20, %v655_v20 }
  0xbc   :  { %v814_v28 = vpack.c.bf16 %v488_v27, %v319_v22  ;;  %v43_v22 = vld [vmem:[%s1954_s0 + $0xd8] sm:$0xff] }
  0xbd   :  { %941 = vst [vmem:[#allocation2 + $0x38] sm:$0xf] %v813_v26  ;;  %v93_v27 = vpack.c.bf16 %v43_v22, %v42_v21 }
  0xbe   :  { %942 = vst [vmem:[#allocation2 + $0x3c] sm:$0xff] %v814_v28  ;;  %v1601_v33 = vpop.f32.mrf.mxu3 }
  0xc0   :  { %v656_v34 = vpop.f32.mrf.mxu2  ;;  %v321_v37 = vpop.f32.mrf.mxu0 }
  0xc1   :  { %v657_v36 = vadd.f32 %v656_v34, %v1546_v31  ;;  %v322_v38 = vadd.f32 %v321_v37, %v1535_v23  ;;  %v490_v39 = vpop.f32.mrf.mxu1 }
  0xc2   :  { %v491_v42 = vadd.f32 %v490_v39, %v1537_v24 }
  0xc3   :  { %v815_v40 = vpack.c.bf16 %v657_v36, %v657_v36  ;;  %1137 = vmatmul.msk.bf16.gmra.mxu0 %vm200_vm0, %v91_v35  ;;  %1185 = vmatmul.msk.bf16.gmra.mxu3 %vm200_vm0, %v1443_v59 }
  0xc4   :  { %v816_v43 = vpack.c.bf16 %v491_v42, %v322_v38  ;;  %1169 = vmatmul.msk.bf16.gmra.mxu1 %vm200_vm0, %v91_v35 }
  0xc5   :  { %943 = vst [vmem:[#allocation2 + $0x44] sm:$0xf] %v815_v40  ;;  %1201 = vmatmul.msk.bf16.gmra.mxu2 %vm200_vm0, %v91_v35 }
  0xc6   :  { %944 = vst [vmem:[#allocation2 + $0x48] sm:$0xff] %v816_v43  ;;  %v1611_v45 = vpop.f32.mrf.mxu3 }
  0xc8   :  { %v659_v46 = vpop.f32.mrf.mxu2  ;;  %v323_v49 = vpop.f32.mrf.mxu0 }
  0xc9   :  { %v660_v48 = vadd.f32 %v659_v46, %v1546_v31  ;;  %v324_v50 = vadd.f32 %v323_v49, %v1535_v23  ;;  %v492_v51 = vpop.f32.mrf.mxu1 }
  0xca   :  { %v493_v54 = vadd.f32 %v492_v51, %v1537_v24  ;;  %v44_v51 = vld [vmem:[%s1954_s0 + $0xe0] sm:$0xff] }
  0xcb   :  { %v817_v52 = vpack.c.bf16 %v660_v48, %v660_v48 }
  0xcc   :  { %v818_v55 = vpack.c.bf16 %v493_v54, %v324_v50 }
  0xcd   :  { %945 = vst [vmem:[#allocation2 + $0x50] sm:$0xf] %v817_v52  ;;  %v45_v52 = vld [vmem:[%s1954_s0 + $0xe8] sm:$0xff] }
  0xce   :  { %946 = vst [vmem:[#allocation2 + $0x54] sm:$0xff] %v818_v55  ;;  %v1622_v60 = vpop.f32.mrf.mxu3  ;;  %v94_v57 = vpack.c.bf16 %v45_v52, %v44_v51  ;;  %v48_v51 = vld [vmem:[%s1954_s0 + $0x100] sm:$0xff]  ;;  %v49_v52 = vld [vmem:[%s1954_s0 + $0x108] sm:$0xff] }
  0xd0   :  { %v661_v61 = vpop.f32.mrf.mxu2  ;;  %v326_v0 = vpop.f32.mrf.mxu0 }
  0xd1   :  { %v662_v63 = vadd.f32 %v661_v61, %v1546_v31  ;;  %v327_v2 = vadd.f32 %v326_v0, %v1535_v23  ;;  %v495_v3 = vpop.f32.mrf.mxu1 }
  0xd2   :  { %v496_v6 = vadd.f32 %v495_v3, %v1537_v24 }
  0xd3   :  { %v819_v4 = vpack.c.bf16 %v662_v63, %v662_v63  ;;  %1138 = vmatmul.msk.bf16.gmra.mxu0 %vm200_vm0, %v92_v62  ;;  %1186 = vmatmul.msk.bf16.gmra.mxu3 %vm200_vm0, %v1462_v1 }
  0xd4   :  { %v820_v8 = vpack.c.bf16 %v496_v6, %v327_v2  ;;  %1170 = vmatmul.msk.bf16.gmra.mxu1 %vm200_vm0, %v92_v62 }
  0xd5   :  { %947 = vst [vmem:[#allocation2 + $0x5c] sm:$0xf] %v819_v4  ;;  %1202 = vmatmul.msk.bf16.gmra.mxu2 %vm200_vm0, %v92_v62 }
  0xd6   :  { %948 = vst [vmem:[#allocation2 + $0x60] sm:$0xff] %v820_v8  ;;  %v1632_v9 = vpop.f32.mrf.mxu3 }
  0xd8   :  { %v664_v10 = vpop.f32.mrf.mxu2  ;;  %v328_v12 = vpop.f32.mrf.mxu0 }
  0xd9   :  { %v665_v11 = vadd.f32 %v664_v10, %v1546_v31  ;;  %v329_v14 = vadd.f32 %v328_v12, %v1535_v23  ;;  %v497_v15 = vpop.f32.mrf.mxu1 }
  0xda   :  { %v498_v18 = vadd.f32 %v497_v15, %v1537_v24 }
  0xdb   :  { %v821_v16 = vpack.c.bf16 %v665_v11, %v665_v11 }
  0xdc   :  { %v822_v20 = vpack.c.bf16 %v498_v18, %v329_v14  ;;  %v46_v18 = vld [vmem:[%s1954_s0 + $0xf0] sm:$0xff] }
  0xdd   :  { %949 = vst [vmem:[#allocation2 + $0x68] sm:$0xf] %v821_v16 }
  0xde   :  { %950 = vst [vmem:[#allocation2 + $0x6c] sm:$0xff] %v822_v20  ;;  %v1643_v25 = vpop.f32.mrf.mxu3  ;;  %v47_v20 = vld [vmem:[%s1954_s0 + $0xf8] sm:$0xff] }
  0xe0   :  { %v666_v26 = vpop.f32.mrf.mxu2  ;;  %v331_v29 = vpop.f32.mrf.mxu0 }
  0xe1   :  { %v667_v28 = vadd.f32 %v666_v26, %v1546_v31  ;;  %v332_v30 = vadd.f32 %v331_v29, %v1535_v23  ;;  %v500_v34 = vpop.f32.mrf.mxu1  ;;  %v95_v26 = vpack.c.bf16 %v47_v20, %v46_v18 }
  0xe2   :  { %v501_v36 = vadd.f32 %v500_v34, %v1537_v24 }
  0xe3   :  { %v823_v35 = vpack.c.bf16 %v667_v28, %v667_v28  ;;  %1139 = vmatmul.msk.bf16.gmra.mxu0 %vm200_vm0, %v93_v27  ;;  %1187 = vmatmul.msk.bf16.gmra.mxu3 %vm200_vm0, %v1481_v7 }
  0xe4   :  { %v824_v37 = vpack.c.bf16 %v501_v36, %v332_v30  ;;  %1171 = vmatmul.msk.bf16.gmra.mxu1 %vm200_vm0, %v93_v27 }
  0xe5   :  { %951 = vst [vmem:[#allocation2 + $0x74] sm:$0xf] %v823_v35  ;;  %1203 = vmatmul.msk.bf16.gmra.mxu2 %vm200_vm0, %v93_v27 }
  0xe6   :  { %952 = vst [vmem:[#allocation2 + $0x78] sm:$0xff] %v824_v37  ;;  %v1653_v38 = vpop.f32.mrf.mxu3 }
  0xe8   :  { %v669_v39 = vpop.f32.mrf.mxu2  ;;  %v333_v42 = vpop.f32.mrf.mxu0 }
  0xe9   :  { %v670_v40 = vadd.f32 %v669_v39, %v1546_v31  ;;  %v334_v43 = vadd.f32 %v333_v42, %v1535_v23  ;;  %v502_v46 = vpop.f32.mrf.mxu1 }
  0xea   :  { %v503_v49 = vadd.f32 %v502_v46, %v1537_v24 }
  0xeb   :  { %v825_v48 = vpack.c.bf16 %v670_v40, %v670_v40 }
  0xec   :  { %v826_v50 = vpack.c.bf16 %v503_v49, %v334_v43 }
  0xed   :  { %953 = vst [vmem:[#allocation2 + $0x80] sm:$0xf] %v825_v48 }
  0xee   :  { %954 = vst [vmem:[#allocation2 + $0x84] sm:$0xff] %v826_v50  ;;  %v1664_v54 = vpop.f32.mrf.mxu3 }
  0xf0   :  { %v671_v55 = vpop.f32.mrf.mxu2  ;;  %v336_v61 = vpop.f32.mrf.mxu0 }
  0xf1   :  { %v672_v58 = vadd.f32 %v671_v55, %v1546_v31  ;;  %v337_v62 = vadd.f32 %v336_v61, %v1535_v23  ;;  %v505_v63 = vpop.f32.mrf.mxu1 }
  0xf2   :  { %v506_v2 = vadd.f32 %v505_v63, %v1537_v24 }
  0xf3   :  { %v827_v0 = vpack.c.bf16 %v672_v58, %v672_v58  ;;  %1140 = vmatmul.msk.bf16.gmra.mxu0 %vm200_vm0, %v94_v57  ;;  %1188 = vmatmul.msk.bf16.gmra.mxu3 %vm200_vm0, %v1500_v13  ;;  %v96_v58 = vpack.c.bf16 %v49_v52, %v48_v51 }
  0xf4   :  { %v828_v3 = vpack.c.bf16 %v506_v2, %v337_v62  ;;  %1172 = vmatmul.msk.bf16.gmra.mxu1 %vm200_vm0, %v94_v57 }
  0xf5   :  { %955 = vst [vmem:[#allocation2 + $0x8c] sm:$0xf] %v827_v0  ;;  %1204 = vmatmul.msk.bf16.gmra.mxu2 %vm200_vm0, %v94_v57 }
  0xf6   :  { %956 = vst [vmem:[#allocation2 + $0x90] sm:$0xff] %v828_v3  ;;  %v1674_v4 = vpop.f32.mrf.mxu3 }
  0xf8   :  { %v674_v6 = vpop.f32.mrf.mxu2  ;;  %v338_v10 = vpop.f32.mrf.mxu0 }
  0xf9   :  { %v675_v8 = vadd.f32 %v674_v6, %v1546_v31  ;;  %v339_v11 = vadd.f32 %v338_v10, %v1535_v23  ;;  %v507_v12 = vpop.f32.mrf.mxu1  ;;  %v427_v10 = vadd.f32 %v1548_v32, %v1535_v23  ;;  %v50_v32 = vld [vmem:[%s1954_s0 + $0x110] sm:$0xff] }
  0xfa   :  { %v508_v15 = vadd.f32 %v507_v12, %v1537_v24 }
  0xfb   :  { %v829_v14 = vpack.c.bf16 %v675_v8, %v675_v8 }
  0xfc   :  { %v830_v16 = vpack.c.bf16 %v508_v15, %v339_v11 }
  0xfd   :  { %957 = vst [vmem:[#allocation2 + $0x98] sm:$0xf] %v829_v14 }
  0xfe   :  { %958 = vst [vmem:[#allocation2 + $0x9c] sm:$0xff] %v830_v16  ;;  %v1685_v21 = vpop.f32.mrf.mxu3 }
 0x100   :  { %v676_v22 = vpop.f32.mrf.mxu2  ;;  %v341_v28 = vpop.f32.mrf.mxu0 }
 0x101   :  { %v677_v27 = vadd.f32 %v676_v22, %v1546_v31  ;;  %v342_v29 = vadd.f32 %v341_v28, %v1535_v23  ;;  %v510_v30 = vpop.f32.mrf.mxu1 }
 0x102   :  { %v511_v35 = vadd.f32 %v510_v30, %v1537_v24 }
 0x103   :  { %v831_v34 = vpack.c.bf16 %v677_v27, %v677_v27  ;;  %1141 = vmatmul.msk.bf16.gmra.mxu0 %vm200_vm0, %v95_v26  ;;  %1189 = vmatmul.msk.bf16.gmra.mxu3 %vm200_vm0, %v1519_v19  ;;  %v51_v27 = vld [vmem:[%s1954_s0 + $0x118] sm:$0xff] }
 0x104   :  { %v832_v36 = vpack.c.bf16 %v511_v35, %v342_v29  ;;  %1173 = vmatmul.msk.bf16.gmra.mxu1 %vm200_vm0, %v95_v26  ;;  %v429_v29 = vadd.f32 %v1559_v44, %v1535_v23  ;;  %v97_v35 = vpack.c.bf16 %v51_v27, %v50_v32  ;;  %v437_v32 = vadd.f32 %v1590_v17, %v1535_v23  ;;  %v54_v17 = vld [vmem:[%s1954_s0 + $0x130] sm:$0xff] }
 0x105   :  { %959 = vst [vmem:[#allocation2 + $0xa4] sm:$0xf] %v831_v34  ;;  %1205 = vmatmul.msk.bf16.gmra.mxu2 %vm200_vm0, %v95_v26 }
 0x106   :  { %960 = vst [vmem:[#allocation2 + $0xa8] sm:$0xff] %v832_v36  ;;  %v1695_v37 = vpop.f32.mrf.mxu3 }
 0x108   :  { %v679_v39 = vpop.f32.mrf.mxu2  ;;  %v343_v42 = vpop.f32.mrf.mxu0 }
 0x109   :  { %v680_v40 = vadd.f32 %v679_v39, %v1546_v31  ;;  %v344_v43 = vadd.f32 %v343_v42, %v1535_v23  ;;  %v512_v46 = vpop.f32.mrf.mxu1 }
 0x10a   :  { %v513_v49 = vadd.f32 %v512_v46, %v1537_v24 }
 0x10b   :  { %v833_v48 = vpack.c.bf16 %v680_v40, %v680_v40 }
 0x10c   :  { %v834_v50 = vpack.c.bf16 %v513_v49, %v344_v43 }
 0x10d   :  { %961 = vst [vmem:[#allocation2 + $0xb0] sm:$0xf] %v833_v48 }
 0x10e   :  { %962 = vst [vmem:[#allocation2 + $0xb4] sm:$0xff] %v834_v50  ;;  %v1706_v55 = vpop.f32.mrf.mxu3  ;;  %v432_v50 = vadd.f32 %v1569_v56, %v1535_v23  ;;  %v52_v56 = vld [vmem:[%s1954_s0 + $0x120] sm:$0xff] }
 0x110   :  { %v681_v57 = vpop.f32.mrf.mxu2  ;;  %v346_v62 = vpop.f32.mrf.mxu0 }
 0x111   :  { %v682_v61 = vadd.f32 %v681_v57, %v1546_v31  ;;  %v347_v63 = vadd.f32 %v346_v62, %v1535_v23  ;;  %v515_v0 = vpop.f32.mrf.mxu1 }
 0x112   :  { %v516_v3 = vadd.f32 %v515_v0, %v1537_v24 }
 0x113   :  { %v835_v2 = vpack.c.bf16 %v682_v61, %v682_v61  ;;  %1142 = vmatmul.msk.bf16.gmra.mxu0 %vm200_vm0, %v96_v58  ;;  %1214 = vmatmul.msk.bf16.vlgmr.msra.gmra.mxu3 %vm200_vm0, %v1385_v41 }
 0x114   :  { %v836_v6 = vpack.c.bf16 %v516_v3, %v347_v63  ;;  %1174 = vmatmul.msk.bf16.gmra.mxu1 %vm200_vm0, %v96_v58  ;;  %v53_v3 = vld [vmem:[%s1954_s0 + $0x128] sm:$0xff] }
 0x115   :  { %963 = vst [vmem:[#allocation2 + $0xbc] sm:$0xf] %v835_v2  ;;  %1206 = vmatmul.msk.bf16.gmra.mxu2 %vm200_vm0, %v96_v58 }
 0x116   :  { %964 = vst [vmem:[#allocation2 + $0xc0] sm:$0xff] %v836_v6  ;;  %v595_v8 = vpop.f32.mrf.mxu3 }
 0x117   :  { %v596_v11 = vadd.f32 %v595_v8, %v1537_v24  ;;  %v434_v8 = vadd.f32 %v1580_v5, %v1535_v23 }
 0x118   :  { %v684_v12 = vpop.f32.mrf.mxu2  ;;  %v348_v15 = vpop.f32.mrf.mxu0 }
 0x119   :  { %v685_v14 = vadd.f32 %v684_v12, %v1546_v31  ;;  %v900_v16 = vpack.c.bf16 %v596_v11, %v427_v10  ;;  %v349_v41 = vadd.f32 %v348_v15, %v1535_v23  ;;  %v517_v18 = vpop.f32.mrf.mxu1  ;;  %v98_v12 = vpack.c.bf16 %v53_v3, %v52_v56 }
 0x11a   :  { %v518_v22 = vadd.f32 %v517_v18, %v1537_v24 }
 0x11b   :  { %v837_v20 = vpack.c.bf16 %v685_v14, %v685_v14  ;;  %1028 = vst [vmem:[#allocation2 + $0x240] sm:$0xff] %v900_v16 }
 0x11c   :  { %v838_v26 = vpack.c.bf16 %v518_v22, %v349_v41 }
 0x11d   :  { %965 = vst [vmem:[#allocation2 + $0xc8] sm:$0xf] %v837_v20 }
 0x11e   :  { %966 = vst [vmem:[#allocation2 + $0xcc] sm:$0xff] %v838_v26  ;;  %v597_v28 = vpop.f32.mrf.mxu3 }
 0x11f   :  { %v598_v30 = vadd.f32 %v597_v28, %v1537_v24 }
 0x120   :  { %v686_v34 = vpop.f32.mrf.mxu2  ;;  %v351_v39 = vpop.f32.mrf.mxu0 }
 0x121   :  { %v687_v36 = vadd.f32 %v686_v34, %v1546_v31  ;;  %v902_v40 = vpack.c.bf16 %v598_v30, %v429_v29  ;;  %v352_v42 = vadd.f32 %v351_v39, %v1535_v23  ;;  %v520_v43 = vpop.f32.mrf.mxu1 }
 0x122   :  { %v521_v48 = vadd.f32 %v520_v43, %v1537_v24 }
 0x123   :  { %v839_v46 = vpack.c.bf16 %v687_v36, %v687_v36  ;;  %1030 = vst [vmem:[#allocation2 + $0x24c] sm:$0xff] %v902_v40  ;;  %1143 = vmatmul.msk.bf16.gmra.mxu0 %vm200_vm0, %v97_v35  ;;  %1215 = vmatmul.msk.bf16.gmra.mxu3 %vm200_vm0, %v1404_v47 }
 0x124   :  { %v840_v44 = vpack.c.bf16 %v521_v48, %v352_v42  ;;  %1175 = vmatmul.msk.bf16.gmra.mxu1 %vm200_vm0, %v97_v35  ;;  %v55_v42 = vld [vmem:[%s1954_s0 + $0x138] sm:$0xff] }
 0x125   :  { %967 = vst [vmem:[#allocation2 + $0xd4] sm:$0xf] %v839_v46  ;;  %1207 = vmatmul.msk.bf16.gmra.mxu2 %vm200_vm0, %v97_v35  ;;  %v439_v46 = vadd.f32 %v1601_v33, %v1535_v23 }
 0x126   :  { %968 = vst [vmem:[#allocation2 + $0xd8] sm:$0xff] %v840_v44  ;;  %v600_v49 = vpop.f32.mrf.mxu3 }
 0x127   :  { %v601_v51 = vadd.f32 %v600_v49, %v1537_v24  ;;  %v99_v49 = vpack.c.bf16 %v55_v42, %v54_v17 }
 0x128   :  { %v689_v52 = vpop.f32.mrf.mxu2  ;;  %v353_v58 = vpop.f32.mrf.mxu0 }
 0x129   :  { %v690_v57 = vadd.f32 %v689_v52, %v1546_v31  ;;  %v904_v61 = vpack.c.bf16 %v601_v51, %v432_v50  ;;  %v354_v47 = vadd.f32 %v353_v58, %v1535_v23  ;;  %v522_v62 = vpop.f32.mrf.mxu1 }
 0x12a   :  { %v523_v0 = vadd.f32 %v522_v62, %v1537_v24 }
 0x12b   :  { %v841_v63 = vpack.c.bf16 %v690_v57, %v690_v57  ;;  %1032 = vst [vmem:[#allocation2 + $0x258] sm:$0xff] %v904_v61 }
 0x12c   :  { %v842_v2 = vpack.c.bf16 %v523_v0, %v354_v47 }
 0x12d   :  { %969 = vst [vmem:[#allocation2 + $0xe0] sm:$0xf] %v841_v63  ;;  %v442_v63 = vadd.f32 %v1611_v45, %v1535_v23  ;;  %v56_v45 = vld [vmem:[%s1954_s0 + $0x140] sm:$0xff] }
 0x12e   :  { %970 = vst [vmem:[#allocation2 + $0xe4] sm:$0xff] %v842_v2  ;;  %v602_v6 = vpop.f32.mrf.mxu3 }
 0x12f   :  { %v603_v10 = vadd.f32 %v602_v6, %v1537_v24 }
 0x130   :  { %v691_v11 = vpop.f32.mrf.mxu2  ;;  %v356_v15 = vpop.f32.mrf.mxu0 }
 0x131   :  { %v692_v14 = vadd.f32 %v691_v11, %v1546_v31  ;;  %v906_v16 = vpack.c.bf16 %v603_v10, %v434_v8  ;;  %v357_v41 = vadd.f32 %v356_v15, %v1535_v23  ;;  %v525_v18 = vpop.f32.mrf.mxu1 }
 0x132   :  { %v526_v22 = vadd.f32 %v525_v18, %v1537_v24 }
 0x133   :  { %v843_v20 = vpack.c.bf16 %v692_v14, %v692_v14  ;;  %1034 = vst [vmem:[#allocation2 + $0x264] sm:$0xff] %v906_v16  ;;  %1144 = vmatmul.msk.bf16.gmra.mxu0 %vm200_vm0, %v98_v12  ;;  %1216 = vmatmul.msk.bf16.gmra.mxu3 %vm200_vm0, %v1424_v53  ;;  %v57_v14 = vld [vmem:[%s1954_s0 + $0x148] sm:$0xff]  ;;  %v444_v16 = vadd.f32 %v1622_v60, %v1535_v23 }
 0x134   :  { %v844_v5 = vpack.c.bf16 %v526_v22, %v357_v41  ;;  %1176 = vmatmul.msk.bf16.gmra.mxu1 %vm200_vm0, %v98_v12 }
 0x135   :  { %971 = vst [vmem:[#allocation2 + $0xec] sm:$0xf] %v843_v20  ;;  %1208 = vmatmul.msk.bf16.gmra.mxu2 %vm200_vm0, %v98_v12  ;;  %v100_v20 = vpack.c.bf16 %v57_v14, %v56_v45  ;;  %v61_v14 = vld [vmem:[%s1954_s0 + $0x168] sm:$0xff] }
 0x136   :  { %972 = vst [vmem:[#allocation2 + $0xf0] sm:$0xff] %v844_v5  ;;  %v605_v26 = vpop.f32.mrf.mxu3 }
 0x137   :  { %v606_v27 = vadd.f32 %v605_v26, %v1537_v24 }
 0x138   :  { %v694_v28 = vpop.f32.mrf.mxu2  ;;  %v358_v30 = vpop.f32.mrf.mxu0 }
 0x139   :  { %v695_v29 = vadd.f32 %v694_v28, %v1546_v31  ;;  %v908_v34 = vpack.c.bf16 %v606_v27, %v437_v32  ;;  %v359_v53 = vadd.f32 %v358_v30, %v1535_v23  ;;  %v527_v35 = vpop.f32.mrf.mxu1 }
 0x13a   :  { %v528_v39 = vadd.f32 %v527_v35, %v1537_v24 }
 0x13b   :  { %v845_v36 = vpack.c.bf16 %v695_v29, %v695_v29  ;;  %1036 = vst [vmem:[#allocation2 + $0x270] sm:$0xff] %v908_v34  ;;  %v447_v34 = vadd.f32 %v1632_v9, %v1535_v23  ;;  %v58_v9 = vld [vmem:[%s1954_s0 + $0x150] sm:$0xff] }
 0x13c   :  { %v846_v40 = vpack.c.bf16 %v528_v39, %v359_v53 }
 0x13d   :  { %973 = vst [vmem:[#allocation2 + $0xf8] sm:$0xf] %v845_v36 }
 0x13e   :  { %974 = vst [vmem:[#allocation2 + $0xfc] sm:$0xff] %v846_v40  ;;  %v607_v43 = vpop.f32.mrf.mxu3 }
 0x13f   :  { %v608_v48 = vadd.f32 %v607_v43, %v1537_v24 }
 0x140   :  { %v696_v44 = vpop.f32.mrf.mxu2  ;;  %v361_v51 = vpop.f32.mrf.mxu0 }
 0x141   :  { %v697_v50 = vadd.f32 %v696_v44, %v1546_v31  ;;  %v910_v52 = vpack.c.bf16 %v608_v48, %v439_v46  ;;  %v362_v57 = vadd.f32 %v361_v51, %v1535_v23  ;;  %v530_v58 = vpop.f32.mrf.mxu1  ;;  %v59_v48 = vld [vmem:[%s1954_s0 + $0x158] sm:$0xff] }
 0x142   :  { %v531_v47 = vadd.f32 %v530_v58, %v1537_v24 }
 0x143   :  { %v847_v61 = vpack.c.bf16 %v697_v50, %v697_v50  ;;  %1038 = vst [vmem:[#allocation2 + $0x27c] sm:$0xff] %v910_v52  ;;  %1145 = vmatmul.msk.bf16.gmra.mxu0 %vm200_vm0, %v99_v49  ;;  %1217 = vmatmul.msk.bf16.gmra.mxu3 %vm200_vm0, %v1443_v59  ;;  %v101_v52 = vpack.c.bf16 %v59_v48, %v58_v9 }
 0x144   :  { %v848_v33 = vpack.c.bf16 %v531_v47, %v362_v57  ;;  %1177 = vmatmul.msk.bf16.gmra.mxu1 %vm200_vm0, %v99_v49  ;;  %v459_v9 = vadd.f32 %v1685_v21, %v1535_v23 }
 0x145   :  { %975 = vst [vmem:[#allocation2 + $0x104] sm:$0xf] %v847_v61  ;;  %1209 = vmatmul.msk.bf16.gmra.mxu2 %vm200_vm0, %v99_v49  ;;  %v449_v49 = vadd.f32 %v1643_v25, %v1535_v23 }
 0x146   :  { %976 = vst [vmem:[#allocation2 + $0x108] sm:$0xff] %v848_v33  ;;  %v610_v62 = vpop.f32.mrf.mxu3 }
 0x147   :  { %v611_v0 = vadd.f32 %v610_v62, %v1537_v24 }
 0x148   :  { %v699_v2 = vpop.f32.mrf.mxu2  ;;  %v363_v3 = vpop.f32.mrf.mxu0 }
 0x149   :  { %v700_v56 = vadd.f32 %v699_v2, %v1546_v31  ;;  %v912_v6 = vpack.c.bf16 %v611_v0, %v442_v63  ;;  %v364_v59 = vadd.f32 %v363_v3, %v1535_v23  ;;  %v532_v8 = vpop.f32.mrf.mxu1  ;;  %v452_v2 = vadd.f32 %v1653_v38, %v1535_v23  ;;  %v60_v38 = vld [vmem:[%s1954_s0 + $0x160] sm:$0xff] }
 0x14a   :  { %v533_v11 = vadd.f32 %v532_v8, %v1537_v24 }
 0x14b   :  { %v849_v10 = vpack.c.bf16 %v700_v56, %v700_v56  ;;  %1040 = vst [vmem:[#allocation2 + $0x288] sm:$0xff] %v912_v6 }
 0x14c   :  { %v850_v12 = vpack.c.bf16 %v533_v11, %v364_v59 }
 0x14d   :  { %977 = vst [vmem:[#allocation2 + $0x110] sm:$0xf] %v849_v10 }
 0x14e   :  { %978 = vst [vmem:[#allocation2 + $0x114] sm:$0xff] %v850_v12  ;;  %v612_v15 = vpop.f32.mrf.mxu3 }
 0x14f   :  { %v613_v41 = vadd.f32 %v612_v15, %v1537_v24 }
 0x150   :  { %v701_v18 = vpop.f32.mrf.mxu2  ;;  %v366_v5 = vpop.f32.mrf.mxu0 }
 0x151   :  { %v702_v22 = vadd.f32 %v701_v18, %v1546_v31  ;;  %v914_v26 = vpack.c.bf16 %v613_v41, %v444_v16  ;;  %v367_v32 = vadd.f32 %v366_v5, %v1535_v23  ;;  %v535_v27 = vpop.f32.mrf.mxu1  ;;  %v454_v16 = vadd.f32 %v1664_v54, %v1535_v23 }
 0x152   :  { %v536_v29 = vadd.f32 %v535_v27, %v1537_v24 }
 0x153   :  { %v851_v28 = vpack.c.bf16 %v702_v22, %v702_v22  ;;  %1042 = vst [vmem:[#allocation2 + $0x294] sm:$0xff] %v914_v26  ;;  %1146 = vmatmul.msk.bf16.gmra.mxu0 %vm200_vm0, %v100_v20  ;;  %1218 = vmatmul.msk.bf16.gmra.mxu3 %vm200_vm0, %v1462_v1 }
 0x154   :  { %v852_v60 = vpack.c.bf16 %v536_v29, %v367_v32  ;;  %1178 = vmatmul.msk.bf16.gmra.mxu1 %vm200_vm0, %v100_v20 }
 0x155   :  { %979 = vst [vmem:[#allocation2 + $0x11c] sm:$0xf] %v851_v28  ;;  %1210 = vmatmul.msk.bf16.gmra.mxu2 %vm200_vm0, %v100_v20  ;;  %v102_v20 = vpack.c.bf16 %v61_v14, %v60_v38 }
 0x156   :  { %980 = vst [vmem:[#allocation2 + $0x120] sm:$0xff] %v852_v60  ;;  %v615_v30 = vpop.f32.mrf.mxu3 }
 0x157   :  { %v616_v53 = vadd.f32 %v615_v30, %v1537_v24  ;;  %v457_v30 = vadd.f32 %v1674_v4, %v1535_v23  ;;  %v62_v4 = vld [vmem:[%s1954_s0 + $0x170] sm:$0xff] }
 0x158   :  { %v704_v35 = vpop.f32.mrf.mxu2  ;;  %v368_v39 = vpop.f32.mrf.mxu0 }
 0x159   :  { %v705_v36 = vadd.f32 %v704_v35, %v1546_v31  ;;  %v916_v40 = vpack.c.bf16 %v616_v53, %v447_v34  ;;  %v369_v1 = vadd.f32 %v368_v39, %v1535_v23  ;;  %v537_v17 = vpop.f32.mrf.mxu1 }
 0x15a   :  { %v538_v43 = vadd.f32 %v537_v17, %v1537_v24 }
 0x15b   :  { %v853_v42 = vpack.c.bf16 %v705_v36, %v705_v36  ;;  %1044 = vst [vmem:[#allocation2 + $0x2a0] sm:$0xff] %v916_v40 }
 0x15c   :  { %v854_v46 = vpack.c.bf16 %v538_v43, %v369_v1  ;;  %v63_v43 = vld [vmem:[%s1954_s0 + $0x178] sm:$0xff]  ;;  %s1275_s0 = smov [#allocation2]  }
 0x15d   :  { %981 = vst [vmem:[#allocation2 + $0x128] sm:$0xf] %v853_v42  ;;  %s1064_s20 = sshll.u32 %s1275_s0, 4  ;;  %s1065_s20 = int_to_ptr.vmem [resolvable:$true] %s1064_s20 }
 0x15e   :  { %982 = vst [vmem:[#allocation2 + $0x12c] sm:$0xff] %v854_v46  ;;  %v617_v44 = vpop.f32.mrf.mxu3 }
 0x15f   :  { %v618_v50 = vadd.f32 %v617_v44, %v1537_v24 }
 0x160   :  { %v706_v51 = vpop.f32.mrf.mxu2  ;;  %v371_v58 = vpop.f32.mrf.mxu0 }
 0x161   :  { %v707_v57 = vadd.f32 %v706_v51, %v1546_v31  ;;  %v918_v61 = vpack.c.bf16 %v618_v50, %v449_v49  ;;  %v372_v47 = vadd.f32 %v371_v58, %v1535_v23  ;;  %v540_v33 = vpop.f32.mrf.mxu1  ;;  %v103_v49 = vpack.c.bf16 %v63_v43, %v62_v4 }
 0x162   :  { %v541_v63 = vadd.f32 %v540_v33, %v1537_v24 }
 0x163   :  { %v855_v62 = vpack.c.bf16 %v707_v57, %v707_v57  ;;  %1046 = vst [vmem:[#allocation2 + $0x2ac] sm:$0xff] %v918_v61  ;;  %1147 = vmatmul.msk.bf16.gmra.mxu0 %vm200_vm0, %v101_v52  ;;  %1219 = vmatmul.msk.bf16.gmra.mxu3 %vm200_vm0, %v1481_v7 }
 0x164   :  { %v856_v25 = vpack.c.bf16 %v541_v63, %v372_v47  ;;  %1179 = vmatmul.msk.bf16.gmra.mxu1 %vm200_vm0, %v101_v52 }
 0x165   :  { %983 = vst [vmem:[#allocation2 + $0x134] sm:$0xf] %v855_v62  ;;  %1211 = vmatmul.msk.bf16.gmra.mxu2 %vm200_vm0, %v101_v52  ;;  %v462_v62 = vadd.f32 %v1695_v37, %v1535_v23  ;;  %v464_v37 = vadd.f32 %v1706_v55, %v1535_v23 }
 0x166   :  { %984 = vst [vmem:[#allocation2 + $0x138] sm:$0xff] %v856_v25  ;;  %v620_v0 = vpop.f32.mrf.mxu3 }
 0x167   :  { %v621_v56 = vadd.f32 %v620_v0, %v1537_v24 }
 0x168   :  { %v709_v3 = vpop.f32.mrf.mxu2  ;;  %v373_v59 = vpop.f32.mrf.mxu0 }
 0x169   :  { %v710_v6 = vadd.f32 %v709_v3, %v1546_v31  ;;  %v920_v8 = vpack.c.bf16 %v621_v56, %v452_v2  ;;  %v374_v7 = vadd.f32 %v373_v59, %v1535_v23  ;;  %v542_v10 = vpop.f32.mrf.mxu1 }
 0x16a   :  { %v543_v12 = vadd.f32 %v542_v10, %v1537_v24 }
 0x16b   :  { %v857_v11 = vpack.c.bf16 %v710_v6, %v710_v6  ;;  %1048 = vst [vmem:[#allocation2 + $0x2b8] sm:$0xff] %v920_v8 }
 0x16c   :  { %v858_v45 = vpack.c.bf16 %v543_v12, %v374_v7 }
 0x16d   :  { %985 = vst [vmem:[#allocation2 + $0x140] sm:$0xf] %v857_v11 }
 0x16e   :  { %986 = vst [vmem:[#allocation2 + $0x144] sm:$0xff] %v858_v45  ;;  %v622_v15 = vpop.f32.mrf.mxu3 }
 0x16f   :  { %v623_v41 = vadd.f32 %v622_v15, %v1537_v24 }
 0x170   :  { %v711_v18 = vpop.f32.mrf.mxu2  ;;  %v376_v5 = vpop.f32.mrf.mxu0 }
 0x171   :  { %v712_v22 = vadd.f32 %v711_v18, %v1546_v31  ;;  %v922_v26 = vpack.c.bf16 %v623_v41, %v454_v16  ;;  %v377_v32 = vadd.f32 %v376_v5, %v1535_v23  ;;  %v545_v27 = vpop.f32.mrf.mxu1 }
 0x172   :  { %v546_v29 = vadd.f32 %v545_v27, %v1537_v24 }
 0x173   :  { %v859_v28 = vpack.c.bf16 %v712_v22, %v712_v22  ;;  %1050 = vst [vmem:[#allocation2 + $0x2c4] sm:$0xff] %v922_v26  ;;  %1148 = vmatmul.msk.bf16.gmra.mxu0 %vm200_vm0, %v102_v20  ;;  %1220 = vmatmul.msk.bf16.gmra.mxu3 %vm200_vm0, %v1500_v13 }
 0x174   :  { %v860_v54 = vpack.c.bf16 %v546_v29, %v377_v32  ;;  %1180 = vmatmul.msk.bf16.gmra.mxu1 %vm200_vm0, %v102_v20 }
 0x175   :  { %987 = vst [vmem:[#allocation2 + $0x14c] sm:$0xf] %v859_v28  ;;  %1212 = vmatmul.msk.bf16.gmra.mxu2 %vm200_vm0, %v102_v20 }
 0x176   :  { %988 = vst [vmem:[#allocation2 + $0x150] sm:$0xff] %v860_v54  ;;  %v625_v60 = vpop.f32.mrf.mxu3 }
 0x177   :  { %v626_v34 = vadd.f32 %v625_v60, %v1537_v24 }
 0x178   :  { %v714_v53 = vpop.f32.mrf.mxu2  ;;  %v378_v36 = vpop.f32.mrf.mxu0 }
 0x179   :  { %v715_v35 = vadd.f32 %v714_v53, %v1546_v31  ;;  %v924_v39 = vpack.c.bf16 %v626_v34, %v457_v30  ;;  %v379_v13 = vadd.f32 %v378_v36, %v1535_v23  ;;  %v547_v40 = vpop.f32.mrf.mxu1 }
 0x17a   :  { %v548_v17 = vadd.f32 %v547_v40, %v1537_v24 }
 0x17b   :  { %v861_v1 = vpack.c.bf16 %v715_v35, %v715_v35  ;;  %1052 = vst [vmem:[#allocation2 + $0x2d0] sm:$0xff] %v924_v39 }
 0x17c   :  { %v862_v42 = vpack.c.bf16 %v548_v17, %v379_v13 }
 0x17d   :  { %989 = vst [vmem:[#allocation2 + $0x158] sm:$0xf] %v861_v1 }
 0x17e   :  { %990 = vst [vmem:[#allocation2 + $0x15c] sm:$0xff] %v862_v42  ;;  %v627_v46 = vpop.f32.mrf.mxu3 }
 0x17f   :  { %v628_v48 = vadd.f32 %v627_v46, %v1537_v24 }
 0x180   :  { %v716_v44 = vpop.f32.mrf.mxu2  ;;  %v381_v51 = vpop.f32.mrf.mxu0 }
 0x181   :  { %v717_v50 = vadd.f32 %v716_v44, %v1546_v31  ;;  %v926_v52 = vpack.c.bf16 %v628_v48, %v459_v9  ;;  %v382_v57 = vadd.f32 %v381_v51, %v1535_v23  ;;  %v550_v58 = vpop.f32.mrf.mxu1 }
 0x182   :  { %v551_v47 = vadd.f32 %v550_v58, %v1537_v24 }
 0x183   :  { %v863_v61 = vpack.c.bf16 %v717_v50, %v717_v50  ;;  %1054 = vst [vmem:[#allocation2 + $0x2dc] sm:$0xff] %v926_v52  ;;  %1149 = vmatmul.msk.bf16.gmra.mxu0 %vm200_vm0, %v103_v49  ;;  %1221 = vmatmul.msk.bf16.gmra.mxu3 %vm200_vm0, %v1519_v19 }
 0x184   :  { %v864_v21 = vpack.c.bf16 %v551_v47, %v382_v57  ;;  %1181 = vmatmul.msk.bf16.gmra.mxu1 %vm200_vm0, %v103_v49 }
 0x185   :  { %991 = vst [vmem:[#allocation2 + $0x164] sm:$0xf] %v863_v61  ;;  %1213 = vmatmul.msk.bf16.gmra.mxu2 %vm200_vm0, %v103_v49 }
 0x186   :  { %992 = vst [vmem:[#allocation2 + $0x168] sm:$0xff] %v864_v21  ;;  %v630_v33 = vpop.f32.mrf.mxu3 }
 0x187   :  { %v631_v63 = vadd.f32 %v630_v33, %v1537_v24 }
 0x188   :  { %v719_v25 = vpop.f32.mrf.mxu2  ;;  %v383_v2 = vpop.f32.mrf.mxu0 }
 0x189   :  { %v720_v0 = vadd.f32 %v719_v25, %v1546_v31  ;;  %v928_v56 = vpack.c.bf16 %v631_v63, %v462_v62  ;;  %v384_v19 = vadd.f32 %v383_v2, %v1535_v23  ;;  %v552_v3 = vpop.f32.mrf.mxu1 }
 0x18a   :  { %v553_v59 = vadd.f32 %v552_v3, %v1537_v24 }
 0x18b   :  { %v865_v6 = vpack.c.bf16 %v720_v0, %v720_v0  ;;  %1056 = vst [vmem:[#allocation2 + $0x2e8] sm:$0xff] %v928_v56 }
 0x18c   :  { %v866_v8 = vpack.c.bf16 %v553_v59, %v384_v19 }
 0x18d   :  { %993 = vst [vmem:[#allocation2 + $0x170] sm:$0xf] %v865_v6 }
 0x18e   :  { %994 = vst [vmem:[#allocation2 + $0x174] sm:$0xff] %v866_v8  ;;  %v632_v7 = vpop.f32.mrf.mxu3 }
 0x18f   :  { %v633_v10 = vadd.f32 %v632_v7, %v1537_v24 }
 0x190   :  { %v721_v11 = vpop.f32.mrf.mxu2  ;;  %v386_v45 = vpop.f32.mrf.mxu0 }
 0x191   :  { %v722_v12 = vadd.f32 %v721_v11, %v1546_v31  ;;  %v930_v38 = vpack.c.bf16 %v633_v10, %v464_v37  ;;  %v387_v14 = vadd.f32 %v386_v45, %v1535_v23  ;;  %v555_v15 = vpop.f32.mrf.mxu1 }
 0x192   :  { %v556_v41 = vadd.f32 %v555_v15, %v1537_v24 }
 0x193   :  { %v867_v16 = vpack.c.bf16 %v722_v12, %v722_v12  ;;  %1058 = vst [vmem:[#allocation2 + $0x2f4] sm:$0xff] %v930_v38 }
 0x194   :  { %v868_v18 = vpack.c.bf16 %v556_v41, %v387_v14 }
 0x195   :  { %995 = vst [vmem:[#allocation2 + $0x17c] sm:$0xf] %v867_v16 }
 0x196   :  { %996 = vst [vmem:[#allocation2 + $0x180] sm:$0xff] %v868_v18  ;;  %v764_v20 = vpop.f32.mrf.mxu3 }
 0x197   :  { %v765_v55 = vadd.f32 %v764_v20, %v1546_v31 }
 0x198   :  { %v724_v22 = vpop.f32.mrf.mxu2  ;;  %v388_v26 = vpop.f32.mrf.mxu0 }
 0x199   :  { %v725_v5 = vadd.f32 %v724_v22, %v1546_v31  ;;  %v901_v32 = vpack.c.bf16 %v765_v55, %v765_v55  ;;  %v389_v27 = vadd.f32 %v388_v26, %v1535_v23  ;;  %v557_v28 = vpop.f32.mrf.mxu1 }
 0x19a   :  { %v558_v54 = vadd.f32 %v557_v28, %v1537_v24 }
 0x19b   :  { %v869_v29 = vpack.c.bf16 %v725_v5, %v725_v5  ;;  %1029 = vst [vmem:[#allocation2 + $0x248] sm:$0xf] %v901_v32 }
 0x19c   :  { %v870_v60 = vpack.c.bf16 %v558_v54, %v389_v27 }
 0x19d   :  { %997 = vst [vmem:[#allocation2 + $0x188] sm:$0xf] %v869_v29 }
 0x19e   :  { %998 = vst [vmem:[#allocation2 + $0x18c] sm:$0xff] %v870_v60  ;;  %v766_v30 = vpop.f32.mrf.mxu3 }
 0x19f   :  { %v767_v53 = vadd.f32 %v766_v30, %v1546_v31 }
 0x1a0   :  { %v726_v34 = vpop.f32.mrf.mxu2  ;;  %v391_v36 = vpop.f32.mrf.mxu0 }
 0x1a1   :  { %v727_v35 = vadd.f32 %v726_v34, %v1546_v31  ;;  %v903_v39 = vpack.c.bf16 %v767_v53, %v767_v53  ;;  %v392_v13 = vadd.f32 %v391_v36, %v1535_v23  ;;  %v560_v40 = vpop.f32.mrf.mxu1 }
 0x1a2   :  { %v561_v17 = vadd.f32 %v560_v40, %v1537_v24 }
 0x1a3   :  { %v871_v1 = vpack.c.bf16 %v727_v35, %v727_v35  ;;  %1031 = vst [vmem:[#allocation2 + $0x254] sm:$0xf] %v903_v39 }
 0x1a4   :  { %v872_v42 = vpack.c.bf16 %v561_v17, %v392_v13 }
 0x1a5   :  { %999 = vst [vmem:[#allocation2 + $0x194] sm:$0xf] %v871_v1 }
 0x1a6   :  { %1000 = vst [vmem:[#allocation2 + $0x198] sm:$0xff] %v872_v42  ;;  %v769_v4 = vpop.f32.mrf.mxu3 }
 0x1a7   :  { %v770_v46 = vadd.f32 %v769_v4, %v1546_v31 }
 0x1a8   :  { %v729_v43 = vpop.f32.mrf.mxu2  ;;  %v393_v48 = vpop.f32.mrf.mxu0 }
 0x1a9   :  { %v730_v9 = vadd.f32 %v729_v43, %v1546_v31  ;;  %v905_v44 = vpack.c.bf16 %v770_v46, %v770_v46  ;;  %v394_v49 = vadd.f32 %v393_v48, %v1535_v23  ;;  %v562_v50 = vpop.f32.mrf.mxu1 }
 0x1aa   :  { %v563_v52 = vadd.f32 %v562_v50, %v1537_v24 }
 0x1ab   :  { %v873_v51 = vpack.c.bf16 %v730_v9, %v730_v9  ;;  %1033 = vst [vmem:[#allocation2 + $0x260] sm:$0xf] %v905_v44 }
 0x1ac   :  { %v874_v57 = vpack.c.bf16 %v563_v52, %v394_v49 }
 0x1ad   :  { %1001 = vst [vmem:[#allocation2 + $0x1a0] sm:$0xf] %v873_v51 }
 0x1ae   :  { %1002 = vst [vmem:[#allocation2 + $0x1a4] sm:$0xff] %v874_v57  ;;  %v771_v58 = vpop.f32.mrf.mxu3 }
 0x1af   :  { %v772_v47 = vadd.f32 %v771_v58, %v1546_v31 }
 0x1b0   :  { %v731_v61 = vpop.f32.mrf.mxu2  ;;  %v396_v33 = vpop.f32.mrf.mxu0 }
 0x1b1   :  { %v732_v21 = vadd.f32 %v731_v61, %v1546_v31  ;;  %v907_v62 = vpack.c.bf16 %v772_v47, %v772_v47  ;;  %v397_v63 = vadd.f32 %v396_v33, %v1535_v23  ;;  %v565_v25 = vpop.f32.mrf.mxu1 }
 0x1b2   :  { %v566_v2 = vadd.f32 %v565_v25, %v1537_v24 }
 0x1b3   :  { %v875_v0 = vpack.c.bf16 %v732_v21, %v732_v21  ;;  %1035 = vst [vmem:[#allocation2 + $0x26c] sm:$0xf] %v907_v62 }
 0x1b4   :  { %v876_v56 = vpack.c.bf16 %v566_v2, %v397_v63 }
 0x1b5   :  { %1003 = vst [vmem:[#allocation2 + $0x1ac] sm:$0xf] %v875_v0 }
 0x1b6   :  { %1004 = vst [vmem:[#allocation2 + $0x1b0] sm:$0xff] %v876_v56  ;;  %v774_v19 = vpop.f32.mrf.mxu3 }
 0x1b7   :  { %v775_v6 = vadd.f32 %v774_v19, %v1546_v31 }
 0x1b8   :  { %v734_v3 = vpop.f32.mrf.mxu2  ;;  %v398_v8 = vpop.f32.mrf.mxu0 }
 0x1b9   :  { %v735_v59 = vadd.f32 %v734_v3, %v1546_v31  ;;  %v909_v7 = vpack.c.bf16 %v775_v6, %v775_v6  ;;  %v399_v37 = vadd.f32 %v398_v8, %v1535_v23  ;;  %v567_v10 = vpop.f32.mrf.mxu1 }
 0x1ba   :  { %v568_v12 = vadd.f32 %v567_v10, %v1537_v24 }
 0x1bb   :  { %v877_v11 = vpack.c.bf16 %v735_v59, %v735_v59  ;;  %1037 = vst [vmem:[#allocation2 + $0x278] sm:$0xf] %v909_v7 }
 0x1bc   :  { %v878_v45 = vpack.c.bf16 %v568_v12, %v399_v37 }
 0x1bd   :  { %1005 = vst [vmem:[#allocation2 + $0x1b8] sm:$0xf] %v877_v11 }
 0x1be   :  { %1006 = vst [vmem:[#allocation2 + $0x1bc] sm:$0xff] %v878_v45  ;;  %v776_v38 = vpop.f32.mrf.mxu3 }
 0x1bf   :  { %v777_v15 = vadd.f32 %v776_v38, %v1546_v31 }
 0x1c0   :  { %v736_v14 = vpop.f32.mrf.mxu2  ;;  %v401_v41 = vpop.f32.mrf.mxu0 }
 0x1c1   :  { %v737_v16 = vadd.f32 %v736_v14, %v1546_v31  ;;  %v911_v18 = vpack.c.bf16 %v777_v15, %v777_v15  ;;  %v402_v20 = vadd.f32 %v401_v41, %v1535_v23  ;;  %v570_v22 = vpop.f32.mrf.mxu1 }
 0x1c2   :  { %v571_v5 = vadd.f32 %v570_v22, %v1537_v24 }
 0x1c3   :  { %v879_v55 = vpack.c.bf16 %v737_v16, %v737_v16  ;;  %1039 = vst [vmem:[#allocation2 + $0x284] sm:$0xf] %v911_v18 }
 0x1c4   :  { %v880_v26 = vpack.c.bf16 %v571_v5, %v402_v20 }
 0x1c5   :  { %1007 = vst [vmem:[#allocation2 + $0x1c4] sm:$0xf] %v879_v55 }
 0x1c6   :  { %1008 = vst [vmem:[#allocation2 + $0x1c8] sm:$0xff] %v880_v26  ;;  %v779_v32 = vpop.f32.mrf.mxu3 }
 0x1c7   :  { %v780_v28 = vadd.f32 %v779_v32, %v1546_v31 }
 0x1c8   :  { %v739_v27 = vpop.f32.mrf.mxu2  ;;  %v403_v54 = vpop.f32.mrf.mxu0 }
 0x1c9   :  { %v740_v29 = vadd.f32 %v739_v27, %v1546_v31  ;;  %v913_v60 = vpack.c.bf16 %v780_v28, %v780_v28  ;;  %v404_v30 = vadd.f32 %v403_v54, %v1535_v23  ;;  %v572_v34 = vpop.f32.mrf.mxu1 }
 0x1ca   :  { %v573_v35 = vadd.f32 %v572_v34, %v1537_v24 }
 0x1cb   :  { %v881_v53 = vpack.c.bf16 %v740_v29, %v740_v29  ;;  %1041 = vst [vmem:[#allocation2 + $0x290] sm:$0xf] %v913_v60 }
 0x1cc   :  { %v882_v36 = vpack.c.bf16 %v573_v35, %v404_v30 }
 0x1cd   :  { %1009 = vst [vmem:[#allocation2 + $0x1d0] sm:$0xf] %v881_v53 }
 0x1ce   :  { %1010 = vst [vmem:[#allocation2 + $0x1d4] sm:$0xff] %v882_v36  ;;  %v781_v39 = vpop.f32.mrf.mxu3 }
 0x1cf   :  { %v782_v40 = vadd.f32 %v781_v39, %v1546_v31 }
 0x1d0   :  { %v741_v13 = vpop.f32.mrf.mxu2  ;;  %v406_v17 = vpop.f32.mrf.mxu0 }
 0x1d1   :  { %v742_v1 = vadd.f32 %v741_v13, %v1546_v31  ;;  %v915_v42 = vpack.c.bf16 %v782_v40, %v782_v40  ;;  %v407_v4 = vadd.f32 %v406_v17, %v1535_v23  ;;  %v575_v43 = vpop.f32.mrf.mxu1 }
 0x1d2   :  { %v576_v9 = vadd.f32 %v575_v43, %v1537_v24 }
 0x1d3   :  { %v883_v46 = vpack.c.bf16 %v742_v1, %v742_v1  ;;  %1043 = vst [vmem:[#allocation2 + $0x29c] sm:$0xf] %v915_v42 }
 0x1d4   :  { %v884_v48 = vpack.c.bf16 %v576_v9, %v407_v4 }
 0x1d5   :  { %1011 = vst [vmem:[#allocation2 + $0x1dc] sm:$0xf] %v883_v46 }
 0x1d6   :  { %1012 = vst [vmem:[#allocation2 + $0x1e0] sm:$0xff] %v884_v48  ;;  %v784_v44 = vpop.f32.mrf.mxu3 }
 0x1d7   :  { %v785_v50 = vadd.f32 %v784_v44, %v1546_v31 }
 0x1d8   :  { %v744_v49 = vpop.f32.mrf.mxu2  ;;  %v408_v52 = vpop.f32.mrf.mxu0 }
 0x1d9   :  { %v745_v51 = vadd.f32 %v744_v49, %v1546_v31  ;;  %v917_v57 = vpack.c.bf16 %v785_v50, %v785_v50  ;;  %v409_v58 = vadd.f32 %v408_v52, %v1535_v23  ;;  %v577_v61 = vpop.f32.mrf.mxu1 }
 0x1da   :  { %v578_v21 = vadd.f32 %v577_v61, %v1537_v24 }
 0x1db   :  { %v885_v47 = vpack.c.bf16 %v745_v51, %v745_v51  ;;  %1045 = vst [vmem:[#allocation2 + $0x2a8] sm:$0xf] %v917_v57 }
 0x1dc   :  { %v886_v33 = vpack.c.bf16 %v578_v21, %v409_v58 }
 0x1dd   :  { %1013 = vst [vmem:[#allocation2 + $0x1e8] sm:$0xf] %v885_v47 }
 0x1de   :  { %1014 = vst [vmem:[#allocation2 + $0x1ec] sm:$0xff] %v886_v33  ;;  %v786_v62 = vpop.f32.mrf.mxu3 }
 0x1df   :  { %v787_v25 = vadd.f32 %v786_v62, %v1546_v31 }
 0x1e0   :  { %v746_v63 = vpop.f32.mrf.mxu2  ;;  %v411_v2 = vpop.f32.mrf.mxu0 }
 0x1e1   :  { %v747_v0 = vadd.f32 %v746_v63, %v1546_v31  ;;  %v919_v56 = vpack.c.bf16 %v787_v25, %v787_v25  ;;  %v412_v19 = vadd.f32 %v411_v2, %v1535_v23  ;;  %v580_v3 = vpop.f32.mrf.mxu1 }
 0x1e2   :  { %v581_v59 = vadd.f32 %v580_v3, %v1537_v24 }
 0x1e3   :  { %v887_v6 = vpack.c.bf16 %v747_v0, %v747_v0  ;;  %1047 = vst [vmem:[#allocation2 + $0x2b4] sm:$0xf] %v919_v56 }
 0x1e4   :  { %v888_v8 = vpack.c.bf16 %v581_v59, %v412_v19 }
 0x1e5   :  { %1015 = vst [vmem:[#allocation2 + $0x1f4] sm:$0xf] %v887_v6 }
 0x1e6   :  { %1016 = vst [vmem:[#allocation2 + $0x1f8] sm:$0xff] %v888_v8  ;;  %v789_v7 = vpop.f32.mrf.mxu3 }
 0x1e7   :  { %v790_v10 = vadd.f32 %v789_v7, %v1546_v31 }
 0x1e8   :  { %v749_v37 = vpop.f32.mrf.mxu2  ;;  %v413_v12 = vpop.f32.mrf.mxu0 }
 0x1e9   :  { %v750_v11 = vadd.f32 %v749_v37, %v1546_v31  ;;  %v921_v45 = vpack.c.bf16 %v790_v10, %v790_v10  ;;  %v414_v38 = vadd.f32 %v413_v12, %v1535_v23  ;;  %v582_v14 = vpop.f32.mrf.mxu1 }
 0x1ea   :  { %v583_v16 = vadd.f32 %v582_v14, %v1537_v24 }
 0x1eb   :  { %v889_v15 = vpack.c.bf16 %v750_v11, %v750_v11  ;;  %1049 = vst [vmem:[#allocation2 + $0x2c0] sm:$0xf] %v921_v45 }
 0x1ec   :  { %v890_v41 = vpack.c.bf16 %v583_v16, %v414_v38 }
 0x1ed   :  { %1017 = vst [vmem:[#allocation2 + $0x200] sm:$0xf] %v889_v15 }
 0x1ee   :  { %1018 = vst [vmem:[#allocation2 + $0x204] sm:$0xff] %v890_v41  ;;  %v791_v18 = vpop.f32.mrf.mxu3 }
 0x1ef   :  { %v792_v22 = vadd.f32 %v791_v18, %v1546_v31 }
 0x1f0   :  { %v751_v20 = vpop.f32.mrf.mxu2  ;;  %v416_v5 = vpop.f32.mrf.mxu0 }
 0x1f1   :  { %v752_v55 = vadd.f32 %v751_v20, %v1546_v31  ;;  %v923_v26 = vpack.c.bf16 %v792_v22, %v792_v22  ;;  %v417_v32 = vadd.f32 %v416_v5, %v1535_v23  ;;  %v585_v27 = vpop.f32.mrf.mxu1 }
 0x1f2   :  { %v586_v29 = vadd.f32 %v585_v27, %v1537_v24 }
 0x1f3   :  { %v891_v28 = vpack.c.bf16 %v752_v55, %v752_v55  ;;  %1051 = vst [vmem:[#allocation2 + $0x2cc] sm:$0xf] %v923_v26 }
 0x1f4   :  { %v892_v54 = vpack.c.bf16 %v586_v29, %v417_v32 }
 0x1f5   :  { %1019 = vst [vmem:[#allocation2 + $0x20c] sm:$0xf] %v891_v28 }
 0x1f6   :  { %1020 = vst [vmem:[#allocation2 + $0x210] sm:$0xff] %v892_v54  ;;  %v794_v60 = vpop.f32.mrf.mxu3 }
 0x1f7   :  { %v795_v34 = vadd.f32 %v794_v60, %v1546_v31 }
 0x1f8   :  { %v754_v30 = vpop.f32.mrf.mxu2  ;;  %v418_v35 = vpop.f32.mrf.mxu0 }
 0x1f9   :  { %v755_v53 = vadd.f32 %v754_v30, %v1546_v31  ;;  %v925_v36 = vpack.c.bf16 %v795_v34, %v795_v34  ;;  %v419_v39 = vadd.f32 %v418_v35, %v1535_v23  ;;  %v587_v13 = vpop.f32.mrf.mxu1 }
 0x1fa   :  { %v588_v1 = vadd.f32 %v587_v13, %v1537_v24 }
 0x1fb   :  { %v893_v40 = vpack.c.bf16 %v755_v53, %v755_v53  ;;  %1053 = vst [vmem:[#allocation2 + $0x2d8] sm:$0xf] %v925_v36 }
 0x1fc   :  { %v894_v17 = vpack.c.bf16 %v588_v1, %v419_v39 }
 0x1fd   :  { %1021 = vst [vmem:[#allocation2 + $0x218] sm:$0xf] %v893_v40 }
 0x1fe   :  { %1022 = vst [vmem:[#allocation2 + $0x21c] sm:$0xff] %v894_v17  ;;  %v796_v42 = vpop.f32.mrf.mxu3 }
 0x1ff   :  { %v797_v43 = vadd.f32 %v796_v42, %v1546_v31 }
 0x200   :  { %v756_v4 = vpop.f32.mrf.mxu2  ;;  %v421_v9 = vpop.f32.mrf.mxu0 }
 0x201   :  { %v757_v46 = vadd.f32 %v756_v4, %v1546_v31  ;;  %v927_v48 = vpack.c.bf16 %v797_v43, %v797_v43  ;;  %v422_v44 = vadd.f32 %v421_v9, %v1535_v23  ;;  %v590_v49 = vpop.f32.mrf.mxu1 }
 0x202   :  { %v591_v51 = vadd.f32 %v590_v49, %v1537_v24 }
 0x203   :  { %v895_v50 = vpack.c.bf16 %v757_v46, %v757_v46  ;;  %1055 = vst [vmem:[#allocation2 + $0x2e4] sm:$0xf] %v927_v48 }
 0x204   :  { %v896_v52 = vpack.c.bf16 %v591_v51, %v422_v44 }
 0x205   :  { %1023 = vst [vmem:[#allocation2 + $0x224] sm:$0xf] %v895_v50 }
 0x206   :  { %1024 = vst [vmem:[#allocation2 + $0x228] sm:$0xff] %v896_v52  ;;  %v799_v57 = vpop.f32.mrf.mxu3 }
 0x207   :  { %v800_v61 = vadd.f32 %v799_v57, %v1546_v31 }
 0x208   :  { %v759_v58 = vpop.f32.mrf.mxu2  ;;  %v423_v21 = vpop.f32.mrf.mxu0 }
 0x209   :  { %v760_v47 = vadd.f32 %v759_v58, %v1546_v31  ;;  %v929_v33 = vpack.c.bf16 %v800_v61, %v800_v61  ;;  %v424_v62 = vadd.f32 %v423_v21, %v1535_v23  ;;  %v592_v63 = vpop.f32.mrf.mxu1 }
 0x20a   :  { %v593_v0 = vadd.f32 %v592_v63, %v1537_v24 }
 0x20b   :  { %v897_v25 = vpack.c.bf16 %v760_v47, %v760_v47  ;;  %1057 = vst [vmem:[#allocation2 + $0x2f0] sm:$0xf] %v929_v33 }
 0x20c   :  { %v898_v2 = vpack.c.bf16 %v593_v0, %v424_v62 }
 0x20d   :  { %1025 = vst [vmem:[#allocation2 + $0x230] sm:$0xf] %v897_v25 }
 0x20e   :  { %1026 = vst [vmem:[#allocation2 + $0x234] sm:$0xff] %v898_v2  ;;  %v801_v56 = vpop.f32.mrf.mxu3 }
 0x20f   :  { %v802_v3 = vadd.f32 %v801_v56, %v1546_v31 }
 0x210   :  { %v761_v19 = vpop.f32.mrf.mxu2 }
 0x211   :  { %v762_v23 = vadd.f32 %v761_v19, %v1546_v31  ;;  %v931_v6 = vpack.c.bf16 %v802_v3, %v802_v3 }
 0x213   :  { %v899_v24 = vpack.c.bf16 %v762_v23, %v762_v23  ;;  %1059 = vst [vmem:[#allocation2 + $0x2fc] sm:$0xf] %v931_v6 }
 0x215   :  { %1027 = vst [vmem:[#allocation2 + $0x23c] sm:$0xf] %v899_v24 }
 0x216   :  { %1072 = dma.vmem_to_hbm [thread:$0]  %s1065_s20, 12288, %s1067_s23, [#allocation3], %s1276_s24, %s1276_s24, %s1277_s25  }
 0x217   :  { %1273 = dma.done.wait [#allocation3], 12288  }
 0x218   :  { %1274 = vsyncadd [#allocation3], 4294955008 }
 0x219   :  { %1077 = vsyncpa [#allocation3], 1 }

</bundles_post_ra>
